<compile_context>
chip_gen: v7x
topology: tpu7x:2x2x1
jax: 0.10.0
libtpu: 0.0.40
codegen_flags: <defaults>
</compile_context>

<pallas_src>
import functools

import jax
import jax.numpy as jnp
import numpy as np
from jax.experimental import pallas as pl
from jax.experimental.pallas import tpu as pltpu

LN_EPS = 1e-5


# --------------------------- LayerNorm kernel ---------------------------------

def _layernorm_kernel(x_ref, g_ref, b_ref, o_ref, *, eps):
    x = x_ref[0].astype(jnp.float32)                       # (D, H*W) — sublane & lane dense
    cnt = x.shape[0] * x.shape[1]
    s = jnp.sum(x, axis=1, keepdims=True)                  # lane reduce  -> (D, 1)
    mean = jnp.sum(s, axis=0, keepdims=True) / cnt         # sublane reduce -> (1, 1)
    d2 = jnp.sum(jnp.square(x - mean), axis=1, keepdims=True)
    var = jnp.sum(d2, axis=0, keepdims=True) / cnt
    inv = jax.lax.rsqrt(var + eps)
    y = (x - mean) * inv * g_ref[0].astype(jnp.float32) + b_ref[0].astype(jnp.float32)
    o_ref[0] = y.astype(o_ref.dtype)


def layernorm_ncdhw(x, weight, bias):
    """nn.LayerNorm([D,H,W]) applied to NCDHW input (normalize per (n, c))."""
    n, c, d, h, w = x.shape
    rows = n * c
    x2 = x.reshape(rows, d, h * w)
    g2 = weight.reshape(1, d, h * w)
    b2 = bias.reshape(1, d, h * w)
    out = pl.pallas_call(
        functools.partial(_layernorm_kernel, eps=LN_EPS),
        out_shape=jax.ShapeDtypeStruct((rows, d, h * w), x.dtype),
        grid=(rows,),
        in_specs=[
            pl.BlockSpec((1, d, h * w), lambda i: (i, 0, 0)),
            pl.BlockSpec((1, d, h * w), lambda i: (0, 0, 0)),
            pl.BlockSpec((1, d, h * w), lambda i: (0, 0, 0)),
        ],
        out_specs=pl.BlockSpec((1, d, h * w), lambda i: (i, 0, 0)),
        compiler_params=pltpu.CompilerParams(dimension_semantics=("parallel",)),
    )(x2, g2, b2)
    return out.reshape(n, c, d, h, w)


# ------------------------- Conv3x3x3 stride-2 kernel ---------------------------

def _conv_kernel(x_ref, w_ref, b_ref, o_ref, stage_ref, *, cin, lp, hq_wq, wq):
    # x_ref:     (1, 8*cin, lpad)  parity-major / channel-minor rows, flat (padded) spatial
    # w_ref:     (cout, 27*cin)    column index = tap*cin + ci, tap = kd*9 + kh*3 + kw
    # b_ref:     (cout, 1)
    # o_ref:     (1, cout, lp)     output in "padded geometry" flat layout (lane-dense)
    # stage_ref: (27*cin, lp) f32  VMEM-only im2col staging (never written to HBM)
    for kd in range(3):
        for kh in range(3):
            for kw in range(3):
                tap = kd * 9 + kh * 3 + kw
                par = (kd % 2) * 4 + (kh % 2) * 2 + (kw % 2)
                off = (kd // 2) * hq_wq + (kh // 2) * wq + (kw // 2)
                stage_ref[pl.ds(tap * cin, cin), :] = (
                    x_ref[0, pl.ds(par * cin, cin), pl.ds(off, lp)].astype(jnp.float32)
                )
    acc = jnp.dot(w_ref[...].astype(jnp.float32), stage_ref[...],
                  preferred_element_type=jnp.float32)          # (cout, lp) on the MXU
    o_ref[0] = (acc + b_ref[...].astype(jnp.float32)).astype(o_ref.dtype)


def conv3x3x3_stride2(x, weight, bias):
    """3D conv, kernel 3x3x3, stride 2, padding 1.

    x: (N, Cin, D, H, W), weight: (Cout, Cin, 3, 3, 3), bias: (Cout,).
    Returns (N, Cout, D//2, H//2, W//2)."""
    n, cin, d, h, w = x.shape
    cout = weight.shape[0]
    assert d % 2 == 0 and h % 2 == 0 and w % 2 == 0, "even spatial dims expected"
    do, ho, wo = d // 2, h // 2, w // 2
    dq, hq, wq = do + 1, ho + 1, wo + 1                # parity-grid extents (padded input / 2)
    lp = dq * hq * wq                                  # flat "padded geometry" length
    pad_flat = hq * wq + wq + 1                        # max tap offset -> keeps reads in-bounds
    lpad = lp + pad_flat

    # Glue (all O(input size), no 27x inflation, no transposes of big arrays):
    # pad -> space-to-depth into 8 parity sub-grids -> flatten spatial.
    xp = jnp.pad(x, ((0, 0), (0, 0), (1, 1), (1, 1), (1, 1)))
    xq = xp.reshape(n, cin, dq, 2, hq, 2, wq, 2).transpose(0, 3, 5, 7, 1, 2, 4, 6)
    xflat = xq.reshape(n, 8 * cin, lp)                 # row = parity*cin + ci
    xflat = jnp.pad(xflat, ((0, 0), (0, 0), (0, pad_flat)))

    w_lhs = weight.transpose(0, 2, 3, 4, 1).reshape(cout, 27 * cin)   # col = tap*cin + ci
    b_col = bias.reshape(cout, 1)

    kernel = functools.partial(_conv_kernel, cin=cin, lp=lp, hq_wq=hq * wq, wq=wq)
    out_flat = pl.pallas_call(
        kernel,
        out_shape=jax.ShapeDtypeStruct((n, cout, lp), x.dtype),
        grid=(n,),
        in_specs=[
            pl.BlockSpec((1, 8 * cin, lpad), lambda i: (i, 0, 0)),
            pl.BlockSpec((cout, 27 * cin), lambda i: (0, 0)),
            pl.BlockSpec((cout, 1), lambda i: (0, 0)),
        ],
        out_specs=pl.BlockSpec((1, cout, lp), lambda i: (i, 0, 0)),
        scratch_shapes=[pltpu.VMEM((27 * cin, lp), jnp.float32)],
        compiler_params=pltpu.CompilerParams(dimension_semantics=("parallel",)),
    )(xflat, w_lhs, b_col)

    # un-flatten the padded-geometry result and drop the garbage border rows.
    out = out_flat.reshape(n, cout, dq, hq, wq)[:, :, :do, :ho, :wo]
    return out


# ------------------------------ Module wrapper ---------------------------------

class ToHiddenLayerPallas:
    def __init__(self, hidden_channel, spatial, key):
        s = spatial
        k1, k2, k3, k4, k5, k6 = jax.random.split(key, 6)
        # LayerNorm affine (randomized here to make the self-test stronger).
        self.ln_w = 1.0 + 0.1 * jax.random.normal(k5, (s, s, s), jnp.float32)
        self.ln_b = 0.1 * jax.random.normal(k6, (s, s, s), jnp.float32)
        # Conv1: 1 -> hidden
        fan1 = 1 * 27
        bnd1 = 1.0 / np.sqrt(fan1)
        self.w1 = jax.random.uniform(k1, (hidden_channel, 1, 3, 3, 3),
                                     jnp.float32, -bnd1, bnd1)
        self.b1 = jax.random.uniform(k2, (hidden_channel,), jnp.float32, -bnd1, bnd1)
        # Conv2: hidden -> hidden
        fan2 = hidden_channel * 27
        bnd2 = 1.0 / np.sqrt(fan2)
        self.w2 = jax.random.uniform(k3, (hidden_channel, hidden_channel, 3, 3, 3),
                                     jnp.float32, -bnd2, bnd2)
        self.b2 = jax.random.uniform(k4, (hidden_channel,), jnp.float32, -bnd2, bnd2)

    def __call__(self, x):
        out = layernorm_ncdhw(x, self.ln_w, self.ln_b)
        out = conv3x3x3_stride2(out, self.w1, self.b1)
        out = conv3x3x3_stride2(out, self.w2, self.b2)
        return out


# --------------------------------- Reference ------------------------------------

def _reference(x, mod):
    n, c, _, _, _ = x.shape
    xr = x.reshape(n, c, -1)
    mean = xr.mean(axis=-1, keepdims=True)
    var = ((xr - mean) ** 2).mean(axis=-1, keepdims=True)
    out = ((xr - mean) / jnp.sqrt(var + LN_EPS)).reshape(x.shape)
    out = out * mod.ln_w[None, None] + mod.ln_b[None, None]

    def conv(y, wt, bs):
        o = jax.lax.conv_general_dilated(
            y, wt, window_strides=(2, 2, 2),
            padding=((1, 1), (1, 1), (1, 1)),
            dimension_numbers=("NCDHW", "OIDHW", "NCDHW"))
        return o + bs.reshape(1, -1, 1, 1, 1)

    out = conv(out, mod.w1, mod.b1)
    out = conv(out, mod.w2, mod.b2)
    return out


if __name__ == "__main__":
    key = jax.random.PRNGKey(0)
    kx, kp = jax.random.split(key)

    N, C, S = 2, 1, 16          # full model uses S=80; scaled down for the test
    HIDDEN = 8

    x = jax.random.normal(kx, (N, C, S, S, S), jnp.float32)
    model = ToHiddenLayerPallas(HIDDEN, S, kp)

    out = jax.block_until_ready(jax.jit(model.__call__)(x))
    assert out.shape == (N, HIDDEN, S // 4, S // 4, S // 4), out.shape

    ref = jax.block_until_ready(jax.jit(functools.partial(_reference, mod=model))(x))
    np.testing.assert_allclose(np.asarray(out), np.asarray(ref), rtol=1e-3, atol=2e-3)

    print("KERNEL_OK")
</pallas_src>

<mosaic_0001>
module attributes {stable_mosaic.version = 11 : i64} {
  func.func @_layernorm_kernel(%arg0: i32, %arg1: memref<1x16x256xf32, #tpu.memory_space<vmem>>, %arg2: memref<1x16x256xf32, #tpu.memory_space<vmem>>, %arg3: memref<1x16x256xf32, #tpu.memory_space<vmem>>, %arg4: memref<1x16x256xf32, #tpu.memory_space<vmem>>) attributes {dimension_semantics = [#tpu.dimension_semantics<parallel>], iteration_bounds = array<i64: 2>, scalar_prefetch = 0 : i64, scratch_operands = 0 : i64, tpu.core_type = #tpu.core_type<tc>, window_params = [{transform_indices = @transform_0, window_bounds = array<i64: 1, 16, 256>}, {pipeline_mode = #tpu.pipeline_mode<synchronous>, transform_indices = @transform_1, window_bounds = array<i64: 1, 16, 256>}, {pipeline_mode = #tpu.pipeline_mode<synchronous>, transform_indices = @transform_2, window_bounds = array<i64: 1, 16, 256>}, {transform_indices = @transform_3, window_bounds = array<i64: 1, 16, 256>}]} {
    %c0 = arith.constant 0 : index
    %c0_0 = arith.constant 0 : index
    %c0_1 = arith.constant 0 : index
    %0 = vector.load %arg1[%c0, %c0_0, %c0_1] : memref<1x16x256xf32, #tpu.memory_space<vmem>>, vector<1x16x256xf32>
    %1 = vector.shape_cast %0 : vector<1x16x256xf32> to vector<16x256xf32>
    %cst = arith.constant dense<0.000000e+00> : vector<16xf32>
    %2 = vector.multi_reduction <add>, %1, %cst [1] : vector<16x256xf32> to vector<16xf32>
    %3 = vector.shape_cast %2 : vector<16xf32> to vector<16x1xf32>
    %cst_2 = arith.constant dense<0.000000e+00> : vector<1xf32>
    %4 = vector.multi_reduction <add>, %3, %cst_2 [0] : vector<16x1xf32> to vector<1xf32>
    %5 = vector.shape_cast %4 : vector<1xf32> to vector<1x1xf32>
    %cst_3 = arith.constant 4.096000e+03 : f32
    %6 = vector.broadcast %cst_3 : f32 to vector<1x1xf32>
    %7 = arith.divf %5, %6 : vector<1x1xf32>
    %8 = vector.broadcast %7 : vector<1x1xf32> to vector<16x256xf32>
    %9 = arith.subf %1, %8 : vector<16x256xf32>
    %10 = arith.mulf %9, %9 : vector<16x256xf32>
    %cst_4 = arith.constant dense<0.000000e+00> : vector<16xf32>
    %11 = vector.multi_reduction <add>, %10, %cst_4 [1] : vector<16x256xf32> to vector<16xf32>
    %12 = vector.shape_cast %11 : vector<16xf32> to vector<16x1xf32>
    %cst_5 = arith.constant dense<0.000000e+00> : vector<1xf32>
    %13 = vector.multi_reduction <add>, %12, %cst_5 [0] : vector<16x1xf32> to vector<1xf32>
    %14 = vector.shape_cast %13 : vector<1xf32> to vector<1x1xf32>
    %cst_6 = arith.constant 4.096000e+03 : f32
    %15 = vector.broadcast %cst_6 : f32 to vector<1x1xf32>
    %16 = arith.divf %14, %15 : vector<1x1xf32>
    %cst_7 = arith.constant 9.99999974E-6 : f32
    %17 = vector.broadcast %cst_7 : f32 to vector<1x1xf32>
    %18 = arith.addf %16, %17 : vector<1x1xf32>
    %19 = math.rsqrt %18 : vector<1x1xf32>
    %20 = vector.broadcast %7 : vector<1x1xf32> to vector<16x256xf32>
    %21 = arith.subf %1, %20 : vector<16x256xf32>
    %22 = vector.broadcast %19 : vector<1x1xf32> to vector<16x256xf32>
    %23 = arith.mulf %21, %22 : vector<16x256xf32>
    %c0_8 = arith.constant 0 : index
    %c0_9 = arith.constant 0 : index
    %c0_10 = arith.constant 0 : index
    %24 = vector.load %arg2[%c0_8, %c0_9, %c0_10] : memref<1x16x256xf32, #tpu.memory_space<vmem>>, vector<1x16x256xf32>
    %25 = vector.shape_cast %24 : vector<1x16x256xf32> to vector<16x256xf32>
    %26 = arith.mulf %23, %25 : vector<16x256xf32>
    %c0_11 = arith.constant 0 : index
    %c0_12 = arith.constant 0 : index
    %c0_13 = arith.constant 0 : index
    %27 = vector.load %arg3[%c0_11, %c0_12, %c0_13] : memref<1x16x256xf32, #tpu.memory_space<vmem>>, vector<1x16x256xf32>
    %28 = vector.shape_cast %27 : vector<1x16x256xf32> to vector<16x256xf32>
    %29 = arith.addf %26, %28 : vector<16x256xf32>
    %c0_14 = arith.constant 0 : index
    %c0_15 = arith.constant 0 : index
    %c0_16 = arith.constant 0 : index
    %30 = vector.load %arg4[%c0_14, %c0_15, %c0_16] : memref<1x16x256xf32, #tpu.memory_space<vmem>>, vector<1x16x256xf32>
    %31 = vector.shape_cast %30 : vector<1x16x256xf32> to vector<16x256xf32>
    %32 = vector.shape_cast %29 : vector<16x256xf32> to vector<1x16x256xf32>
    tpu.vector_store %arg4[%c0_14, %c0_15, %c0_16], %32 {strides = array<i32>} : memref<1x16x256xf32, #tpu.memory_space<vmem>>, vector<1x16x256xf32>,
    return
  }
  func.func @transform_0(%arg0: i32) -> (i32, i32, i32) {
    %c0_i32 = arith.constant 0 : i32
    %c0_i32_0 = arith.constant 0 : i32
    %c0_i32_1 = arith.constant 0 : i32
    return %arg0, %c0_i32, %c0_i32_0 : i32, i32, i32
  }
  func.func @transform_1(%arg0: i32) -> (i32, i32, i32) {
    %c0_i32 = arith.constant 0 : i32
    %c0_i32_0 = arith.constant 0 : i32
    %c0_i32_1 = arith.constant 0 : i32
    %c0_i32_2 = arith.constant 0 : i32
    return %c0_i32, %c0_i32_0, %c0_i32_1 : i32, i32, i32
  }
  func.func @transform_2(%arg0: i32) -> (i32, i32, i32) {
    %c0_i32 = arith.constant 0 : i32
    %c0_i32_0 = arith.constant 0 : i32
    %c0_i32_1 = arith.constant 0 : i32
    %c0_i32_2 = arith.constant 0 : i32
    return %c0_i32, %c0_i32_0, %c0_i32_1 : i32, i32, i32
  }
  func.func @transform_3(%arg0: i32) -> (i32, i32, i32) {
    %c0_i32 = arith.constant 0 : i32
    %c0_i32_0 = arith.constant 0 : i32
    %c0_i32_1 = arith.constant 0 : i32
    return %arg0, %c0_i32, %c0_i32_0 : i32, i32, i32
  }
}

module attributes {stable_mosaic.version = 11 : i64} {
  func.func @_conv_kernel(%arg0: i32, %arg1: memref<1x8x820xf32, #tpu.memory_space<vmem>>, %arg2: memref<8x27xf32, #tpu.memory_space<vmem>>, %arg3: memref<8x1xf32, #tpu.memory_space<vmem>>, %arg4: memref<1x8x729xf32, #tpu.memory_space<vmem>>, %arg5: memref<27x729xf32, #tpu.memory_space<vmem>>) attributes {dimension_semantics = [#tpu.dimension_semantics<parallel>], iteration_bounds = array<i64: 2>, scalar_prefetch = 0 : i64, scratch_operands = 1 : i64, tpu.core_type = #tpu.core_type<tc>, window_params = [{transform_indices = @transform_0, window_bounds = array<i64: 1, 8, 820>}, {pipeline_mode = #tpu.pipeline_mode<synchronous>, transform_indices = @transform_1, window_bounds = array<i64: 8, 27>}, {pipeline_mode = #tpu.pipeline_mode<synchronous>, transform_indices = @transform_2, window_bounds = array<i64: 8, 1>}, {transform_indices = @transform_3, window_bounds = array<i64: 1, 8, 729>}]} {
    %c0 = arith.constant 0 : index
    %c0_0 = arith.constant 0 : index
    %c0_1 = arith.constant 0 : index
    %0 = vector.load %arg1[%c0, %c0_0, %c0_1] : memref<1x8x820xf32, #tpu.memory_space<vmem>>, vector<1x1x729xf32>
    %1 = vector.shape_cast %0 : vector<1x1x729xf32> to vector<1x729xf32>
    %c0_2 = arith.constant 0 : index
    %c0_3 = arith.constant 0 : index
    %2 = vector.load %arg5[%c0_2, %c0_3] : memref<27x729xf32, #tpu.memory_space<vmem>>, vector<1x729xf32>
    tpu.vector_store %arg5[%c0_2, %c0_3], %1 {strides = array<i32>} : memref<27x729xf32, #tpu.memory_space<vmem>>, vector<1x729xf32>,
    %c0_4 = arith.constant 0 : index
    %c1 = arith.constant 1 : index
    %c0_5 = arith.constant 0 : index
    %3 = vector.load %arg1[%c0_4, %c1, %c0_5] : memref<1x8x820xf32, #tpu.memory_space<vmem>>, vector<1x1x729xf32>
    %4 = vector.shape_cast %3 : vector<1x1x729xf32> to vector<1x729xf32>
    %c1_6 = arith.constant 1 : index
    %c0_7 = arith.constant 0 : index
    %5 = vector.load %arg5[%c1_6, %c0_7] : memref<27x729xf32, #tpu.memory_space<vmem>>, vector<1x729xf32>
    tpu.vector_store %arg5[%c1_6, %c0_7], %4 {strides = array<i32>} : memref<27x729xf32, #tpu.memory_space<vmem>>, vector<1x729xf32>,
    %c0_8 = arith.constant 0 : index
    %c0_9 = arith.constant 0 : index
    %c1_10 = arith.constant 1 : index
    %6 = vector.load %arg1[%c0_8, %c0_9, %c1_10] : memref<1x8x820xf32, #tpu.memory_space<vmem>>, vector<1x1x729xf32>
    %7 = vector.shape_cast %6 : vector<1x1x729xf32> to vector<1x729xf32>
    %c2 = arith.constant 2 : index
    %c0_11 = arith.constant 0 : index
    %8 = vector.load %arg5[%c2, %c0_11] : memref<27x729xf32, #tpu.memory_space<vmem>>, vector<1x729xf32>
    tpu.vector_store %arg5[%c2, %c0_11], %7 {strides = array<i32>} : memref<27x729xf32, #tpu.memory_space<vmem>>, vector<1x729xf32>,
    %c0_12 = arith.constant 0 : index
    %c2_13 = arith.constant 2 : index
    %c0_14 = arith.constant 0 : index
    %9 = vector.load %arg1[%c0_12, %c2_13, %c0_14] : memref<1x8x820xf32, #tpu.memory_space<vmem>>, vector<1x1x729xf32>
    %10 = vector.shape_cast %9 : vector<1x1x729xf32> to vector<1x729xf32>
    %c3 = arith.constant 3 : index
    %c0_15 = arith.constant 0 : index
    %11 = vector.load %arg5[%c3, %c0_15] : memref<27x729xf32, #tpu.memory_space<vmem>>, vector<1x729xf32>
    tpu.vector_store %arg5[%c3, %c0_15], %10 {strides = array<i32>} : memref<27x729xf32, #tpu.memory_space<vmem>>, vector<1x729xf32>,
    %c0_16 = arith.constant 0 : index
    %c3_17 = arith.constant 3 : index
    %c0_18 = arith.constant 0 : index
    %12 = vector.load %arg1[%c0_16, %c3_17, %c0_18] : memref<1x8x820xf32, #tpu.memory_space<vmem>>, vector<1x1x729xf32>
    %13 = vector.shape_cast %12 : vector<1x1x729xf32> to vector<1x729xf32>
    %c4 = arith.constant 4 : index
    %c0_19 = arith.constant 0 : index
    %14 = vector.load %arg5[%c4, %c0_19] : memref<27x729xf32, #tpu.memory_space<vmem>>, vector<1x729xf32>
    tpu.vector_store %arg5[%c4, %c0_19], %13 {strides = array<i32>} : memref<27x729xf32, #tpu.memory_space<vmem>>, vector<1x729xf32>,
    %c0_20 = arith.constant 0 : index
    %c2_21 = arith.constant 2 : index
    %c1_22 = arith.constant 1 : index
    %15 = vector.load %arg1[%c0_20, %c2_21, %c1_22] : memref<1x8x820xf32, #tpu.memory_space<vmem>>, vector<1x1x729xf32>
    %16 = vector.shape_cast %15 : vector<1x1x729xf32> to vector<1x729xf32>
    %c5 = arith.constant 5 : index
    %c0_23 = arith.constant 0 : index
    %17 = vector.load %arg5[%c5, %c0_23] : memref<27x729xf32, #tpu.memory_space<vmem>>, vector<1x729xf32>
    tpu.vector_store %arg5[%c5, %c0_23], %16 {strides = array<i32>} : memref<27x729xf32, #tpu.memory_space<vmem>>, vector<1x729xf32>,
    %c0_24 = arith.constant 0 : index
    %c0_25 = arith.constant 0 : index
    %c9 = arith.constant 9 : index
    %18 = vector.load %arg1[%c0_24, %c0_25, %c9] : memref<1x8x820xf32, #tpu.memory_space<vmem>>, vector<1x1x729xf32>
    %19 = vector.shape_cast %18 : vector<1x1x729xf32> to vector<1x729xf32>
    %c6 = arith.constant 6 : index
    %c0_26 = arith.constant 0 : index
    %20 = vector.load %arg5[%c6, %c0_26] : memref<27x729xf32, #tpu.memory_space<vmem>>, vector<1x729xf32>
    tpu.vector_store %arg5[%c6, %c0_26], %19 {strides = array<i32>} : memref<27x729xf32, #tpu.memory_space<vmem>>, vector<1x729xf32>,
    %c0_27 = arith.constant 0 : index
    %c1_28 = arith.constant 1 : index
    %c9_29 = arith.constant 9 : index
    %21 = vector.load %arg1[%c0_27, %c1_28, %c9_29] : memref<1x8x820xf32, #tpu.memory_space<vmem>>, vector<1x1x729xf32>
    %22 = vector.shape_cast %21 : vector<1x1x729xf32> to vector<1x729xf32>
    %c7 = arith.constant 7 : index
    %c0_30 = arith.constant 0 : index
    %23 = vector.load %arg5[%c7, %c0_30] : memref<27x729xf32, #tpu.memory_space<vmem>>, vector<1x729xf32>
    tpu.vector_store %arg5[%c7, %c0_30], %22 {strides = array<i32>} : memref<27x729xf32, #tpu.memory_space<vmem>>, vector<1x729xf32>,
    %c0_31 = arith.constant 0 : index
    %c0_32 = arith.constant 0 : index
    %c10 = arith.constant 10 : index
    %24 = vector.load %arg1[%c0_31, %c0_32, %c10] : memref<1x8x820xf32, #tpu.memory_space<vmem>>, vector<1x1x729xf32>
    %25 = vector.shape_cast %24 : vector<1x1x729xf32> to vector<1x729xf32>
    %c8 = arith.constant 8 : index
    %c0_33 = arith.constant 0 : index
    %26 = vector.load %arg5[%c8, %c0_33] : memref<27x729xf32, #tpu.memory_space<vmem>>, vector<1x729xf32>
    tpu.vector_store %arg5[%c8, %c0_33], %25 {strides = array<i32>} : memref<27x729xf32, #tpu.memory_space<vmem>>, vector<1x729xf32>,
    %c0_34 = arith.constant 0 : index
    %c4_35 = arith.constant 4 : index
    %c0_36 = arith.constant 0 : index
    %27 = vector.load %arg1[%c0_34, %c4_35, %c0_36] : memref<1x8x820xf32, #tpu.memory_space<vmem>>, vector<1x1x729xf32>
    %28 = vector.shape_cast %27 : vector<1x1x729xf32> to vector<1x729xf32>
    %c9_37 = arith.constant 9 : index
    %c0_38 = arith.constant 0 : index
    %29 = vector.load %arg5[%c9_37, %c0_38] : memref<27x729xf32, #tpu.memory_space<vmem>>, vector<1x729xf32>
    tpu.vector_store %arg5[%c9_37, %c0_38], %28 {strides = array<i32>} : memref<27x729xf32, #tpu.memory_space<vmem>>, vector<1x729xf32>,
    %c0_39 = arith.constant 0 : index
    %c5_40 = arith.constant 5 : index
    %c0_41 = arith.constant 0 : index
    %30 = vector.load %arg1[%c0_39, %c5_40, %c0_41] : memref<1x8x820xf32, #tpu.memory_space<vmem>>, vector<1x1x729xf32>
    %31 = vector.shape_cast %30 : vector<1x1x729xf32> to vector<1x729xf32>
    %c10_42 = arith.constant 10 : index
    %c0_43 = arith.constant 0 : index
    %32 = vector.load %arg5[%c10_42, %c0_43] : memref<27x729xf32, #tpu.memory_space<vmem>>, vector<1x729xf32>
    tpu.vector_store %arg5[%c10_42, %c0_43], %31 {strides = array<i32>} : memref<27x729xf32, #tpu.memory_space<vmem>>, vector<1x729xf32>,
    %c0_44 = arith.constant 0 : index
    %c4_45 = arith.constant 4 : index
    %c1_46 = arith.constant 1 : index
    %33 = vector.load %arg1[%c0_44, %c4_45, %c1_46] : memref<1x8x820xf32, #tpu.memory_space<vmem>>, vector<1x1x729xf32>
    %34 = vector.shape_cast %33 : vector<1x1x729xf32> to vector<1x729xf32>
    %c11 = arith.constant 11 : index
    %c0_47 = arith.constant 0 : index
    %35 = vector.load %arg5[%c11, %c0_47] : memref<27x729xf32, #tpu.memory_space<vmem>>, vector<1x729xf32>
    tpu.vector_store %arg5[%c11, %c0_47], %34 {strides = array<i32>} : memref<27x729xf32, #tpu.memory_space<vmem>>, vector<1x729xf32>,
    %c0_48 = arith.constant 0 : index
    %c6_49 = arith.constant 6 : index
    %c0_50 = arith.constant 0 : index
    %36 = vector.load %arg1[%c0_48, %c6_49, %c0_50] : memref<1x8x820xf32, #tpu.memory_space<vmem>>, vector<1x1x729xf32>
    %37 = vector.shape_cast %36 : vector<1x1x729xf32> to vector<1x729xf32>
    %c12 = arith.constant 12 : index
    %c0_51 = arith.constant 0 : index
    %38 = vector.load %arg5[%c12, %c0_51] : memref<27x729xf32, #tpu.memory_space<vmem>>, vector<1x729xf32>
    tpu.vector_store %arg5[%c12, %c0_51], %37 {strides = array<i32>} : memref<27x729xf32, #tpu.memory_space<vmem>>, vector<1x729xf32>,
    %c0_52 = arith.constant 0 : index
    %c7_53 = arith.constant 7 : index
    %c0_54 = arith.constant 0 : index
    %39 = vector.load %arg1[%c0_52, %c7_53, %c0_54] : memref<1x8x820xf32, #tpu.memory_space<vmem>>, vector<1x1x729xf32>
    %40 = vector.shape_cast %39 : vector<1x1x729xf32> to vector<1x729xf32>
    %c13 = arith.constant 13 : index
    %c0_55 = arith.constant 0 : index
    %41 = vector.load %arg5[%c13, %c0_55] : memref<27x729xf32, #tpu.memory_space<vmem>>, vector<1x729xf32>
    tpu.vector_store %arg5[%c13, %c0_55], %40 {strides = array<i32>} : memref<27x729xf32, #tpu.memory_space<vmem>>, vector<1x729xf32>,
    %c0_56 = arith.constant 0 : index
    %c6_57 = arith.constant 6 : index
    %c1_58 = arith.constant 1 : index
    %42 = vector.load %arg1[%c0_56, %c6_57, %c1_58] : memref<1x8x820xf32, #tpu.memory_space<vmem>>, vector<1x1x729xf32>
    %43 = vector.shape_cast %42 : vector<1x1x729xf32> to vector<1x729xf32>
    %c14 = arith.constant 14 : index
    %c0_59 = arith.constant 0 : index
    %44 = vector.load %arg5[%c14, %c0_59] : memref<27x729xf32, #tpu.memory_space<vmem>>, vector<1x729xf32>
    tpu.vector_store %arg5[%c14, %c0_59], %43 {strides = array<i32>} : memref<27x729xf32, #tpu.memory_space<vmem>>, vector<1x729xf32>,
    %c0_60 = arith.constant 0 : index
    %c4_61 = arith.constant 4 : index
    %c9_62 = arith.constant 9 : index
    %45 = vector.load %arg1[%c0_60, %c4_61, %c9_62] : memref<1x8x820xf32, #tpu.memory_space<vmem>>, vector<1x1x729xf32>
    %46 = vector.shape_cast %45 : vector<1x1x729xf32> to vector<1x729xf32>
    %c15 = arith.constant 15 : index
    %c0_63 = arith.constant 0 : index
    %47 = vector.load %arg5[%c15, %c0_63] : memref<27x729xf32, #tpu.memory_space<vmem>>, vector<1x729xf32>
    tpu.vector_store %arg5[%c15, %c0_63], %46 {strides = array<i32>} : memref<27x729xf32, #tpu.memory_space<vmem>>, vector<1x729xf32>,
    %c0_64 = arith.constant 0 : index
    %c5_65 = arith.constant 5 : index
    %c9_66 = arith.constant 9 : index
    %48 = vector.load %arg1[%c0_64, %c5_65, %c9_66] : memref<1x8x820xf32, #tpu.memory_space<vmem>>, vector<1x1x729xf32>
    %49 = vector.shape_cast %48 : vector<1x1x729xf32> to vector<1x729xf32>
    %c16 = arith.constant 16 : index
    %c0_67 = arith.constant 0 : index
    %50 = vector.load %arg5[%c16, %c0_67] : memref<27x729xf32, #tpu.memory_space<vmem>>, vector<1x729xf32>
    tpu.vector_store %arg5[%c16, %c0_67], %49 {strides = array<i32>} : memref<27x729xf32, #tpu.memory_space<vmem>>, vector<1x729xf32>,
    %c0_68 = arith.constant 0 : index
    %c4_69 = arith.constant 4 : index
    %c10_70 = arith.constant 10 : index
    %51 = vector.load %arg1[%c0_68, %c4_69, %c10_70] : memref<1x8x820xf32, #tpu.memory_space<vmem>>, vector<1x1x729xf32>
    %52 = vector.shape_cast %51 : vector<1x1x729xf32> to vector<1x729xf32>
    %c17 = arith.constant 17 : index
    %c0_71 = arith.constant 0 : index
    %53 = vector.load %arg5[%c17, %c0_71] : memref<27x729xf32, #tpu.memory_space<vmem>>, vector<1x729xf32>
    tpu.vector_store %arg5[%c17, %c0_71], %52 {strides = array<i32>} : memref<27x729xf32, #tpu.memory_space<vmem>>, vector<1x729xf32>,
    %c0_72 = arith.constant 0 : index
    %c0_73 = arith.constant 0 : index
    %c81 = arith.constant 81 : index
    %54 = vector.load %arg1[%c0_72, %c0_73, %c81] : memref<1x8x820xf32, #tpu.memory_space<vmem>>, vector<1x1x729xf32>
    %55 = vector.shape_cast %54 : vector<1x1x729xf32> to vector<1x729xf32>
    %c18 = arith.constant 18 : index
    %c0_74 = arith.constant 0 : index
    %56 = vector.load %arg5[%c18, %c0_74] : memref<27x729xf32, #tpu.memory_space<vmem>>, vector<1x729xf32>
    tpu.vector_store %arg5[%c18, %c0_74], %55 {strides = array<i32>} : memref<27x729xf32, #tpu.memory_space<vmem>>, vector<1x729xf32>,
    %c0_75 = arith.constant 0 : index
    %c1_76 = arith.constant 1 : index
    %c81_77 = arith.constant 81 : index
    %57 = vector.load %arg1[%c0_75, %c1_76, %c81_77] : memref<1x8x820xf32, #tpu.memory_space<vmem>>, vector<1x1x729xf32>
    %58 = vector.shape_cast %57 : vector<1x1x729xf32> to vector<1x729xf32>
    %c19 = arith.constant 19 : index
    %c0_78 = arith.constant 0 : index
    %59 = vector.load %arg5[%c19, %c0_78] : memref<27x729xf32, #tpu.memory_space<vmem>>, vector<1x729xf32>
    tpu.vector_store %arg5[%c19, %c0_78], %58 {strides = array<i32>} : memref<27x729xf32, #tpu.memory_space<vmem>>, vector<1x729xf32>,
    %c0_79 = arith.constant 0 : index
    %c0_80 = arith.constant 0 : index
    %c82 = arith.constant 82 : index
    %60 = vector.load %arg1[%c0_79, %c0_80, %c82] : memref<1x8x820xf32, #tpu.memory_space<vmem>>, vector<1x1x729xf32>
    %61 = vector.shape_cast %60 : vector<1x1x729xf32> to vector<1x729xf32>
    %c20 = arith.constant 20 : index
    %c0_81 = arith.constant 0 : index
    %62 = vector.load %arg5[%c20, %c0_81] : memref<27x729xf32, #tpu.memory_space<vmem>>, vector<1x729xf32>
    tpu.vector_store %arg5[%c20, %c0_81], %61 {strides = array<i32>} : memref<27x729xf32, #tpu.memory_space<vmem>>, vector<1x729xf32>,
    %c0_82 = arith.constant 0 : index
    %c2_83 = arith.constant 2 : index
    %c81_84 = arith.constant 81 : index
    %63 = vector.load %arg1[%c0_82, %c2_83, %c81_84] : memref<1x8x820xf32, #tpu.memory_space<vmem>>, vector<1x1x729xf32>
    %64 = vector.shape_cast %63 : vector<1x1x729xf32> to vector<1x729xf32>
    %c21 = arith.constant 21 : index
    %c0_85 = arith.constant 0 : index
    %65 = vector.load %arg5[%c21, %c0_85] : memref<27x729xf32, #tpu.memory_space<vmem>>, vector<1x729xf32>
    tpu.vector_store %arg5[%c21, %c0_85], %64 {strides = array<i32>} : memref<27x729xf32, #tpu.memory_space<vmem>>, vector<1x729xf32>,
    %c0_86 = arith.constant 0 : index
    %c3_87 = arith.constant 3 : index
    %c81_88 = arith.constant 81 : index
    %66 = vector.load %arg1[%c0_86, %c3_87, %c81_88] : memref<1x8x820xf32, #tpu.memory_space<vmem>>, vector<1x1x729xf32>
    %67 = vector.shape_cast %66 : vector<1x1x729xf32> to vector<1x729xf32>
    %c22 = arith.constant 22 : index
    %c0_89 = arith.constant 0 : index
    %68 = vector.load %arg5[%c22, %c0_89] : memref<27x729xf32, #tpu.memory_space<vmem>>, vector<1x729xf32>
    tpu.vector_store %arg5[%c22, %c0_89], %67 {strides = array<i32>} : memref<27x729xf32, #tpu.memory_space<vmem>>, vector<1x729xf32>,
    %c0_90 = arith.constant 0 : index
    %c2_91 = arith.constant 2 : index
    %c82_92 = arith.constant 82 : index
    %69 = vector.load %arg1[%c0_90, %c2_91, %c82_92] : memref<1x8x820xf32, #tpu.memory_space<vmem>>, vector<1x1x729xf32>
    %70 = vector.shape_cast %69 : vector<1x1x729xf32> to vector<1x729xf32>
    %c23 = arith.constant 23 : index
    %c0_93 = arith.constant 0 : index
    %71 = vector.load %arg5[%c23, %c0_93] : memref<27x729xf32, #tpu.memory_space<vmem>>, vector<1x729xf32>
    tpu.vector_store %arg5[%c23, %c0_93], %70 {strides = array<i32>} : memref<27x729xf32, #tpu.memory_space<vmem>>, vector<1x729xf32>,
    %c0_94 = arith.constant 0 : index
    %c0_95 = arith.constant 0 : index
    %c90 = arith.constant 90 : index
    %72 = vector.load %arg1[%c0_94, %c0_95, %c90] : memref<1x8x820xf32, #tpu.memory_space<vmem>>, vector<1x1x729xf32>
    %73 = vector.shape_cast %72 : vector<1x1x729xf32> to vector<1x729xf32>
    %c24 = arith.constant 24 : index
    %c0_96 = arith.constant 0 : index
    %74 = vector.load %arg5[%c24, %c0_96] : memref<27x729xf32, #tpu.memory_space<vmem>>, vector<1x729xf32>
    tpu.vector_store %arg5[%c24, %c0_96], %73 {strides = array<i32>} : memref<27x729xf32, #tpu.memory_space<vmem>>, vector<1x729xf32>,
    %c0_97 = arith.constant 0 : index
    %c1_98 = arith.constant 1 : index
    %c90_99 = arith.constant 90 : index
    %75 = vector.load %arg1[%c0_97, %c1_98, %c90_99] : memref<1x8x820xf32, #tpu.memory_space<vmem>>, vector<1x1x729xf32>
    %76 = vector.shape_cast %75 : vector<1x1x729xf32> to vector<1x729xf32>
    %c25 = arith.constant 25 : index
    %c0_100 = arith.constant 0 : index
    %77 = vector.load %arg5[%c25, %c0_100] : memref<27x729xf32, #tpu.memory_space<vmem>>, vector<1x729xf32>
    tpu.vector_store %arg5[%c25, %c0_100], %76 {strides = array<i32>} : memref<27x729xf32, #tpu.memory_space<vmem>>, vector<1x729xf32>,
    %c0_101 = arith.constant 0 : index
    %c0_102 = arith.constant 0 : index
    %c91 = arith.constant 91 : index
    %78 = vector.load %arg1[%c0_101, %c0_102, %c91] : memref<1x8x820xf32, #tpu.memory_space<vmem>>, vector<1x1x729xf32>
    %79 = vector.shape_cast %78 : vector<1x1x729xf32> to vector<1x729xf32>
    %c26 = arith.constant 26 : index
    %c0_103 = arith.constant 0 : index
    %80 = vector.load %arg5[%c26, %c0_103] : memref<27x729xf32, #tpu.memory_space<vmem>>, vector<1x729xf32>
    tpu.vector_store %arg5[%c26, %c0_103], %79 {strides = array<i32>} : memref<27x729xf32, #tpu.memory_space<vmem>>, vector<1x729xf32>,
    %c0_104 = arith.constant 0 : index
    %c0_105 = arith.constant 0 : index
    %81 = vector.load %arg2[%c0_104, %c0_105] : memref<8x27xf32, #tpu.memory_space<vmem>>, vector<8x27xf32>
    %c0_106 = arith.constant 0 : index
    %c0_107 = arith.constant 0 : index
    %82 = vector.load %arg5[%c0_106, %c0_107] : memref<27x729xf32, #tpu.memory_space<vmem>>, vector<27x729xf32>
    %cst = arith.constant dense<0.000000e+00> : vector<8x729xf32>
    %83 = tpu.matmul %81, %82, %cst {dimension_numbers = #tpu.dot_dimension_numbers<[1], [0], [0], [1], [0, 0, 1, 1], [], []>} : vector<8x27xf32>, vector<27x729xf32>, vector<8x729xf32> -> vector<8x729xf32>
    %c0_108 = arith.constant 0 : index
    %c0_109 = arith.constant 0 : index
    %84 = vector.load %arg3[%c0_108, %c0_109] : memref<8x1xf32, #tpu.memory_space<vmem>>, vector<8x1xf32>
    %85 = vector.broadcast %84 : vector<8x1xf32> to vector<8x729xf32>
    %86 = arith.addf %83, %85 : vector<8x729xf32>
    %c0_110 = arith.constant 0 : index
    %c0_111 = arith.constant 0 : index
    %c0_112 = arith.constant 0 : index
    %87 = vector.load %arg4[%c0_110, %c0_111, %c0_112] : memref<1x8x729xf32, #tpu.memory_space<vmem>>, vector<1x8x729xf32>
    %88 = vector.shape_cast %87 : vector<1x8x729xf32> to vector<8x729xf32>
    %89 = vector.shape_cast %86 : vector<8x729xf32> to vector<1x8x729xf32>
    tpu.vector_store %arg4[%c0_110, %c0_111, %c0_112], %89 {strides = array<i32>} : memref<1x8x729xf32, #tpu.memory_space<vmem>>, vector<1x8x729xf32>,
    return
  }
  func.func @transform_0(%arg0: i32) -> (i32, i32, i32) {
    %c0_i32 = arith.constant 0 : i32
    %c0_i32_0 = arith.constant 0 : i32
    %c0_i32_1 = arith.constant 0 : i32
    return %arg0, %c0_i32, %c0_i32_0 : i32, i32, i32
  }
  func.func @transform_1(%arg0: i32) -> (i32, i32) {
    %c0_i32 = arith.constant 0 : i32
    %c0_i32_0 = arith.constant 0 : i32
    %c0_i32_1 = arith.constant 0 : i32
    return %c0_i32, %c0_i32_0 : i32, i32
  }
  func.func @transform_2(%arg0: i32) -> (i32, i32) {
    %c0_i32 = arith.constant 0 : i32
    %c0_i32_0 = arith.constant 0 : i32
    %c0_i32_1 = arith.constant 0 : i32
    return %c0_i32, %c0_i32_0 : i32, i32
  }
  func.func @transform_3(%arg0: i32) -> (i32, i32, i32) {
    %c0_i32 = arith.constant 0 : i32
    %c0_i32_0 = arith.constant 0 : i32
    %c0_i32_1 = arith.constant 0 : i32
    return %arg0, %c0_i32, %c0_i32_0 : i32, i32, i32
  }
}

module attributes {stable_mosaic.version = 11 : i64} {
  func.func @_conv_kernel(%arg0: i32, %arg1: memref<1x64x156xf32, #tpu.memory_space<vmem>>, %arg2: memref<8x216xf32, #tpu.memory_space<vmem>>, %arg3: memref<8x1xf32, #tpu.memory_space<vmem>>, %arg4: memref<1x8x125xf32, #tpu.memory_space<vmem>>, %arg5: memref<216x125xf32, #tpu.memory_space<vmem>>) attributes {dimension_semantics = [#tpu.dimension_semantics<parallel>], iteration_bounds = array<i64: 2>, scalar_prefetch = 0 : i64, scratch_operands = 1 : i64, tpu.core_type = #tpu.core_type<tc>, window_params = [{transform_indices = @transform_0, window_bounds = array<i64: 1, 64, 156>}, {pipeline_mode = #tpu.pipeline_mode<synchronous>, transform_indices = @transform_1, window_bounds = array<i64: 8, 216>}, {pipeline_mode = #tpu.pipeline_mode<synchronous>, transform_indices = @transform_2, window_bounds = array<i64: 8, 1>}, {transform_indices = @transform_3, window_bounds = array<i64: 1, 8, 125>}]} {
    %c0 = arith.constant 0 : index
    %c0_0 = arith.constant 0 : index
    %c0_1 = arith.constant 0 : index
    %0 = vector.load %arg1[%c0, %c0_0, %c0_1] : memref<1x64x156xf32, #tpu.memory_space<vmem>>, vector<1x8x125xf32>
    %1 = vector.shape_cast %0 : vector<1x8x125xf32> to vector<8x125xf32>
    %c0_2 = arith.constant 0 : index
    %c0_3 = arith.constant 0 : index
    %2 = vector.load %arg5[%c0_2, %c0_3] : memref<216x125xf32, #tpu.memory_space<vmem>>, vector<8x125xf32>
    tpu.vector_store %arg5[%c0_2, %c0_3], %1 {strides = array<i32>} : memref<216x125xf32, #tpu.memory_space<vmem>>, vector<8x125xf32>,
    %c0_4 = arith.constant 0 : index
    %c8 = arith.constant 8 : index
    %c0_5 = arith.constant 0 : index
    %3 = vector.load %arg1[%c0_4, %c8, %c0_5] : memref<1x64x156xf32, #tpu.memory_space<vmem>>, vector<1x8x125xf32>
    %4 = vector.shape_cast %3 : vector<1x8x125xf32> to vector<8x125xf32>
    %c8_6 = arith.constant 8 : index
    %c0_7 = arith.constant 0 : index
    %5 = vector.load %arg5[%c8_6, %c0_7] : memref<216x125xf32, #tpu.memory_space<vmem>>, vector<8x125xf32>
    tpu.vector_store %arg5[%c8_6, %c0_7], %4 {strides = array<i32>} : memref<216x125xf32, #tpu.memory_space<vmem>>, vector<8x125xf32>,
    %c0_8 = arith.constant 0 : index
    %c0_9 = arith.constant 0 : index
    %c1 = arith.constant 1 : index
    %6 = vector.load %arg1[%c0_8, %c0_9, %c1] : memref<1x64x156xf32, #tpu.memory_space<vmem>>, vector<1x8x125xf32>
    %7 = vector.shape_cast %6 : vector<1x8x125xf32> to vector<8x125xf32>
    %c16 = arith.constant 16 : index
    %c0_10 = arith.constant 0 : index
    %8 = vector.load %arg5[%c16, %c0_10] : memref<216x125xf32, #tpu.memory_space<vmem>>, vector<8x125xf32>
    tpu.vector_store %arg5[%c16, %c0_10], %7 {strides = array<i32>} : memref<216x125xf32, #tpu.memory_space<vmem>>, vector<8x125xf32>,
    %c0_11 = arith.constant 0 : index
    %c16_12 = arith.constant 16 : index
    %c0_13 = arith.constant 0 : index
    %9 = vector.load %arg1[%c0_11, %c16_12, %c0_13] : memref<1x64x156xf32, #tpu.memory_space<vmem>>, vector<1x8x125xf32>
    %10 = vector.shape_cast %9 : vector<1x8x125xf32> to vector<8x125xf32>
    %c24 = arith.constant 24 : index
    %c0_14 = arith.constant 0 : index
    %11 = vector.load %arg5[%c24, %c0_14] : memref<216x125xf32, #tpu.memory_space<vmem>>, vector<8x125xf32>
    tpu.vector_store %arg5[%c24, %c0_14], %10 {strides = array<i32>} : memref<216x125xf32, #tpu.memory_space<vmem>>, vector<8x125xf32>,
    %c0_15 = arith.constant 0 : index
    %c24_16 = arith.constant 24 : index
    %c0_17 = arith.constant 0 : index
    %12 = vector.load %arg1[%c0_15, %c24_16, %c0_17] : memref<1x64x156xf32, #tpu.memory_space<vmem>>, vector<1x8x125xf32>
    %13 = vector.shape_cast %12 : vector<1x8x125xf32> to vector<8x125xf32>
    %c32 = arith.constant 32 : index
    %c0_18 = arith.constant 0 : index
    %14 = vector.load %arg5[%c32, %c0_18] : memref<216x125xf32, #tpu.memory_space<vmem>>, vector<8x125xf32>
    tpu.vector_store %arg5[%c32, %c0_18], %13 {strides = array<i32>} : memref<216x125xf32, #tpu.memory_space<vmem>>, vector<8x125xf32>,
    %c0_19 = arith.constant 0 : index
    %c16_20 = arith.constant 16 : index
    %c1_21 = arith.constant 1 : index
    %15 = vector.load %arg1[%c0_19, %c16_20, %c1_21] : memref<1x64x156xf32, #tpu.memory_space<vmem>>, vector<1x8x125xf32>
    %16 = vector.shape_cast %15 : vector<1x8x125xf32> to vector<8x125xf32>
    %c40 = arith.constant 40 : index
    %c0_22 = arith.constant 0 : index
    %17 = vector.load %arg5[%c40, %c0_22] : memref<216x125xf32, #tpu.memory_space<vmem>>, vector<8x125xf32>
    tpu.vector_store %arg5[%c40, %c0_22], %16 {strides = array<i32>} : memref<216x125xf32, #tpu.memory_space<vmem>>, vector<8x125xf32>,
    %c0_23 = arith.constant 0 : index
    %c0_24 = arith.constant 0 : index
    %c5 = arith.constant 5 : index
    %18 = vector.load %arg1[%c0_23, %c0_24, %c5] : memref<1x64x156xf32, #tpu.memory_space<vmem>>, vector<1x8x125xf32>
    %19 = vector.shape_cast %18 : vector<1x8x125xf32> to vector<8x125xf32>
    %c48 = arith.constant 48 : index
    %c0_25 = arith.constant 0 : index
    %20 = vector.load %arg5[%c48, %c0_25] : memref<216x125xf32, #tpu.memory_space<vmem>>, vector<8x125xf32>
    tpu.vector_store %arg5[%c48, %c0_25], %19 {strides = array<i32>} : memref<216x125xf32, #tpu.memory_space<vmem>>, vector<8x125xf32>,
    %c0_26 = arith.constant 0 : index
    %c8_27 = arith.constant 8 : index
    %c5_28 = arith.constant 5 : index
    %21 = vector.load %arg1[%c0_26, %c8_27, %c5_28] : memref<1x64x156xf32, #tpu.memory_space<vmem>>, vector<1x8x125xf32>
    %22 = vector.shape_cast %21 : vector<1x8x125xf32> to vector<8x125xf32>
    %c56 = arith.constant 56 : index
    %c0_29 = arith.constant 0 : index
    %23 = vector.load %arg5[%c56, %c0_29] : memref<216x125xf32, #tpu.memory_space<vmem>>, vector<8x125xf32>
    tpu.vector_store %arg5[%c56, %c0_29], %22 {strides = array<i32>} : memref<216x125xf32, #tpu.memory_space<vmem>>, vector<8x125xf32>,
    %c0_30 = arith.constant 0 : index
    %c0_31 = arith.constant 0 : index
    %c6 = arith.constant 6 : index
    %24 = vector.load %arg1[%c0_30, %c0_31, %c6] : memref<1x64x156xf32, #tpu.memory_space<vmem>>, vector<1x8x125xf32>
    %25 = vector.shape_cast %24 : vector<1x8x125xf32> to vector<8x125xf32>
    %c64 = arith.constant 64 : index
    %c0_32 = arith.constant 0 : index
    %26 = vector.load %arg5[%c64, %c0_32] : memref<216x125xf32, #tpu.memory_space<vmem>>, vector<8x125xf32>
    tpu.vector_store %arg5[%c64, %c0_32], %25 {strides = array<i32>} : memref<216x125xf32, #tpu.memory_space<vmem>>, vector<8x125xf32>,
    %c0_33 = arith.constant 0 : index
    %c32_34 = arith.constant 32 : index
    %c0_35 = arith.constant 0 : index
    %27 = vector.load %arg1[%c0_33, %c32_34, %c0_35] : memref<1x64x156xf32, #tpu.memory_space<vmem>>, vector<1x8x125xf32>
    %28 = vector.shape_cast %27 : vector<1x8x125xf32> to vector<8x125xf32>
    %c72 = arith.constant 72 : index
    %c0_36 = arith.constant 0 : index
    %29 = vector.load %arg5[%c72, %c0_36] : memref<216x125xf32, #tpu.memory_space<vmem>>, vector<8x125xf32>
    tpu.vector_store %arg5[%c72, %c0_36], %28 {strides = array<i32>} : memref<216x125xf32, #tpu.memory_space<vmem>>, vector<8x125xf32>,
    %c0_37 = arith.constant 0 : index
    %c40_38 = arith.constant 40 : index
    %c0_39 = arith.constant 0 : index
    %30 = vector.load %arg1[%c0_37, %c40_38, %c0_39] : memref<1x64x156xf32, #tpu.memory_space<vmem>>, vector<1x8x125xf32>
    %31 = vector.shape_cast %30 : vector<1x8x125xf32> to vector<8x125xf32>
    %c80 = arith.constant 80 : index
    %c0_40 = arith.constant 0 : index
    %32 = vector.load %arg5[%c80, %c0_40] : memref<216x125xf32, #tpu.memory_space<vmem>>, vector<8x125xf32>
    tpu.vector_store %arg5[%c80, %c0_40], %31 {strides = array<i32>} : memref<216x125xf32, #tpu.memory_space<vmem>>, vector<8x125xf32>,
    %c0_41 = arith.constant 0 : index
    %c32_42 = arith.constant 32 : index
    %c1_43 = arith.constant 1 : index
    %33 = vector.load %arg1[%c0_41, %c32_42, %c1_43] : memref<1x64x156xf32, #tpu.memory_space<vmem>>, vector<1x8x125xf32>
    %34 = vector.shape_cast %33 : vector<1x8x125xf32> to vector<8x125xf32>
    %c88 = arith.constant 88 : index
    %c0_44 = arith.constant 0 : index
    %35 = vector.load %arg5[%c88, %c0_44] : memref<216x125xf32, #tpu.memory_space<vmem>>, vector<8x125xf32>
    tpu.vector_store %arg5[%c88, %c0_44], %34 {strides = array<i32>} : memref<216x125xf32, #tpu.memory_space<vmem>>, vector<8x125xf32>,
    %c0_45 = arith.constant 0 : index
    %c48_46 = arith.constant 48 : index
    %c0_47 = arith.constant 0 : index
    %36 = vector.load %arg1[%c0_45, %c48_46, %c0_47] : memref<1x64x156xf32, #tpu.memory_space<vmem>>, vector<1x8x125xf32>
    %37 = vector.shape_cast %36 : vector<1x8x125xf32> to vector<8x125xf32>
    %c96 = arith.constant 96 : index
    %c0_48 = arith.constant 0 : index
    %38 = vector.load %arg5[%c96, %c0_48] : memref<216x125xf32, #tpu.memory_space<vmem>>, vector<8x125xf32>
    tpu.vector_store %arg5[%c96, %c0_48], %37 {strides = array<i32>} : memref<216x125xf32, #tpu.memory_space<vmem>>, vector<8x125xf32>,
    %c0_49 = arith.constant 0 : index
    %c56_50 = arith.constant 56 : index
    %c0_51 = arith.constant 0 : index
    %39 = vector.load %arg1[%c0_49, %c56_50, %c0_51] : memref<1x64x156xf32, #tpu.memory_space<vmem>>, vector<1x8x125xf32>
    %40 = vector.shape_cast %39 : vector<1x8x125xf32> to vector<8x125xf32>
    %c104 = arith.constant 104 : index
    %c0_52 = arith.constant 0 : index
    %41 = vector.load %arg5[%c104, %c0_52] : memref<216x125xf32, #tpu.memory_space<vmem>>, vector<8x125xf32>
    tpu.vector_store %arg5[%c104, %c0_52], %40 {strides = array<i32>} : memref<216x125xf32, #tpu.memory_space<vmem>>, vector<8x125xf32>,
    %c0_53 = arith.constant 0 : index
    %c48_54 = arith.constant 48 : index
    %c1_55 = arith.constant 1 : index
    %42 = vector.load %arg1[%c0_53, %c48_54, %c1_55] : memref<1x64x156xf32, #tpu.memory_space<vmem>>, vector<1x8x125xf32>
    %43 = vector.shape_cast %42 : vector<1x8x125xf32> to vector<8x125xf32>
    %c112 = arith.constant 112 : index
    %c0_56 = arith.constant 0 : index
    %44 = vector.load %arg5[%c112, %c0_56] : memref<216x125xf32, #tpu.memory_space<vmem>>, vector<8x125xf32>
    tpu.vector_store %arg5[%c112, %c0_56], %43 {strides = array<i32>} : memref<216x125xf32, #tpu.memory_space<vmem>>, vector<8x125xf32>,
    %c0_57 = arith.constant 0 : index
    %c32_58 = arith.constant 32 : index
    %c5_59 = arith.constant 5 : index
    %45 = vector.load %arg1[%c0_57, %c32_58, %c5_59] : memref<1x64x156xf32, #tpu.memory_space<vmem>>, vector<1x8x125xf32>
    %46 = vector.shape_cast %45 : vector<1x8x125xf32> to vector<8x125xf32>
    %c120 = arith.constant 120 : index
    %c0_60 = arith.constant 0 : index
    %47 = vector.load %arg5[%c120, %c0_60] : memref<216x125xf32, #tpu.memory_space<vmem>>, vector<8x125xf32>
    tpu.vector_store %arg5[%c120, %c0_60], %46 {strides = array<i32>} : memref<216x125xf32, #tpu.memory_space<vmem>>, vector<8x125xf32>,
    %c0_61 = arith.constant 0 : index
    %c40_62 = arith.constant 40 : index
    %c5_63 = arith.constant 5 : index
    %48 = vector.load %arg1[%c0_61, %c40_62, %c5_63] : memref<1x64x156xf32, #tpu.memory_space<vmem>>, vector<1x8x125xf32>
    %49 = vector.shape_cast %48 : vector<1x8x125xf32> to vector<8x125xf32>
    %c128 = arith.constant 128 : index
    %c0_64 = arith.constant 0 : index
    %50 = vector.load %arg5[%c128, %c0_64] : memref<216x125xf32, #tpu.memory_space<vmem>>, vector<8x125xf32>
    tpu.vector_store %arg5[%c128, %c0_64], %49 {strides = array<i32>} : memref<216x125xf32, #tpu.memory_space<vmem>>, vector<8x125xf32>,
    %c0_65 = arith.constant 0 : index
    %c32_66 = arith.constant 32 : index
    %c6_67 = arith.constant 6 : index
    %51 = vector.load %arg1[%c0_65, %c32_66, %c6_67] : memref<1x64x156xf32, #tpu.memory_space<vmem>>, vector<1x8x125xf32>
    %52 = vector.shape_cast %51 : vector<1x8x125xf32> to vector<8x125xf32>
    %c136 = arith.constant 136 : index
    %c0_68 = arith.constant 0 : index
    %53 = vector.load %arg5[%c136, %c0_68] : memref<216x125xf32, #tpu.memory_space<vmem>>, vector<8x125xf32>
    tpu.vector_store %arg5[%c136, %c0_68], %52 {strides = array<i32>} : memref<216x125xf32, #tpu.memory_space<vmem>>, vector<8x125xf32>,
    %c0_69 = arith.constant 0 : index
    %c0_70 = arith.constant 0 : index
    %c25 = arith.constant 25 : index
    %54 = vector.load %arg1[%c0_69, %c0_70, %c25] : memref<1x64x156xf32, #tpu.memory_space<vmem>>, vector<1x8x125xf32>
    %55 = vector.shape_cast %54 : vector<1x8x125xf32> to vector<8x125xf32>
    %c144 = arith.constant 144 : index
    %c0_71 = arith.constant 0 : index
    %56 = vector.load %arg5[%c144, %c0_71] : memref<216x125xf32, #tpu.memory_space<vmem>>, vector<8x125xf32>
    tpu.vector_store %arg5[%c144, %c0_71], %55 {strides = array<i32>} : memref<216x125xf32, #tpu.memory_space<vmem>>, vector<8x125xf32>,
    %c0_72 = arith.constant 0 : index
    %c8_73 = arith.constant 8 : index
    %c25_74 = arith.constant 25 : index
    %57 = vector.load %arg1[%c0_72, %c8_73, %c25_74] : memref<1x64x156xf32, #tpu.memory_space<vmem>>, vector<1x8x125xf32>
    %58 = vector.shape_cast %57 : vector<1x8x125xf32> to vector<8x125xf32>
    %c152 = arith.constant 152 : index
    %c0_75 = arith.constant 0 : index
    %59 = vector.load %arg5[%c152, %c0_75] : memref<216x125xf32, #tpu.memory_space<vmem>>, vector<8x125xf32>
    tpu.vector_store %arg5[%c152, %c0_75], %58 {strides = array<i32>} : memref<216x125xf32, #tpu.memory_space<vmem>>, vector<8x125xf32>,
    %c0_76 = arith.constant 0 : index
    %c0_77 = arith.constant 0 : index
    %c26 = arith.constant 26 : index
    %60 = vector.load %arg1[%c0_76, %c0_77, %c26] : memref<1x64x156xf32, #tpu.memory_space<vmem>>, vector<1x8x125xf32>
    %61 = vector.shape_cast %60 : vector<1x8x125xf32> to vector<8x125xf32>
    %c160 = arith.constant 160 : index
    %c0_78 = arith.constant 0 : index
    %62 = vector.load %arg5[%c160, %c0_78] : memref<216x125xf32, #tpu.memory_space<vmem>>, vector<8x125xf32>
    tpu.vector_store %arg5[%c160, %c0_78], %61 {strides = array<i32>} : memref<216x125xf32, #tpu.memory_space<vmem>>, vector<8x125xf32>,
    %c0_79 = arith.constant 0 : index
    %c16_80 = arith.constant 16 : index
    %c25_81 = arith.constant 25 : index
    %63 = vector.load %arg1[%c0_79, %c16_80, %c25_81] : memref<1x64x156xf32, #tpu.memory_space<vmem>>, vector<1x8x125xf32>
    %64 = vector.shape_cast %63 : vector<1x8x125xf32> to vector<8x125xf32>
    %c168 = arith.constant 168 : index
    %c0_82 = arith.constant 0 : index
    %65 = vector.load %arg5[%c168, %c0_82] : memref<216x125xf32, #tpu.memory_space<vmem>>, vector<8x125xf32>
    tpu.vector_store %arg5[%c168, %c0_82], %64 {strides = array<i32>} : memref<216x125xf32, #tpu.memory_space<vmem>>, vector<8x125xf32>,
    %c0_83 = arith.constant 0 : index
    %c24_84 = arith.constant 24 : index
    %c25_85 = arith.constant 25 : index
    %66 = vector.load %arg1[%c0_83, %c24_84, %c25_85] : memref<1x64x156xf32, #tpu.memory_space<vmem>>, vector<1x8x125xf32>
    %67 = vector.shape_cast %66 : vector<1x8x125xf32> to vector<8x125xf32>
    %c176 = arith.constant 176 : index
    %c0_86 = arith.constant 0 : index
    %68 = vector.load %arg5[%c176, %c0_86] : memref<216x125xf32, #tpu.memory_space<vmem>>, vector<8x125xf32>
    tpu.vector_store %arg5[%c176, %c0_86], %67 {strides = array<i32>} : memref<216x125xf32, #tpu.memory_space<vmem>>, vector<8x125xf32>,
    %c0_87 = arith.constant 0 : index
    %c16_88 = arith.constant 16 : index
    %c26_89 = arith.constant 26 : index
    %69 = vector.load %arg1[%c0_87, %c16_88, %c26_89] : memref<1x64x156xf32, #tpu.memory_space<vmem>>, vector<1x8x125xf32>
    %70 = vector.shape_cast %69 : vector<1x8x125xf32> to vector<8x125xf32>
    %c184 = arith.constant 184 : index
    %c0_90 = arith.constant 0 : index
    %71 = vector.load %arg5[%c184, %c0_90] : memref<216x125xf32, #tpu.memory_space<vmem>>, vector<8x125xf32>
    tpu.vector_store %arg5[%c184, %c0_90], %70 {strides = array<i32>} : memref<216x125xf32, #tpu.memory_space<vmem>>, vector<8x125xf32>,
    %c0_91 = arith.constant 0 : index
    %c0_92 = arith.constant 0 : index
    %c30 = arith.constant 30 : index
    %72 = vector.load %arg1[%c0_91, %c0_92, %c30] : memref<1x64x156xf32, #tpu.memory_space<vmem>>, vector<1x8x125xf32>
    %73 = vector.shape_cast %72 : vector<1x8x125xf32> to vector<8x125xf32>
    %c192 = arith.constant 192 : index
    %c0_93 = arith.constant 0 : index
    %74 = vector.load %arg5[%c192, %c0_93] : memref<216x125xf32, #tpu.memory_space<vmem>>, vector<8x125xf32>
    tpu.vector_store %arg5[%c192, %c0_93], %73 {strides = array<i32>} : memref<216x125xf32, #tpu.memory_space<vmem>>, vector<8x125xf32>,
    %c0_94 = arith.constant 0 : index
    %c8_95 = arith.constant 8 : index
    %c30_96 = arith.constant 30 : index
    %75 = vector.load %arg1[%c0_94, %c8_95, %c30_96] : memref<1x64x156xf32, #tpu.memory_space<vmem>>, vector<1x8x125xf32>
    %76 = vector.shape_cast %75 : vector<1x8x125xf32> to vector<8x125xf32>
    %c200 = arith.constant 200 : index
    %c0_97 = arith.constant 0 : index
    %77 = vector.load %arg5[%c200, %c0_97] : memref<216x125xf32, #tpu.memory_space<vmem>>, vector<8x125xf32>
    tpu.vector_store %arg5[%c200, %c0_97], %76 {strides = array<i32>} : memref<216x125xf32, #tpu.memory_space<vmem>>, vector<8x125xf32>,
    %c0_98 = arith.constant 0 : index
    %c0_99 = arith.constant 0 : index
    %c31 = arith.constant 31 : index
    %78 = vector.load %arg1[%c0_98, %c0_99, %c31] : memref<1x64x156xf32, #tpu.memory_space<vmem>>, vector<1x8x125xf32>
    %79 = vector.shape_cast %78 : vector<1x8x125xf32> to vector<8x125xf32>
    %c208 = arith.constant 208 : index
    %c0_100 = arith.constant 0 : index
    %80 = vector.load %arg5[%c208, %c0_100] : memref<216x125xf32, #tpu.memory_space<vmem>>, vector<8x125xf32>
    tpu.vector_store %arg5[%c208, %c0_100], %79 {strides = array<i32>} : memref<216x125xf32, #tpu.memory_space<vmem>>, vector<8x125xf32>,
    %c0_101 = arith.constant 0 : index
    %c0_102 = arith.constant 0 : index
    %81 = vector.load %arg2[%c0_101, %c0_102] : memref<8x216xf32, #tpu.memory_space<vmem>>, vector<8x216xf32>
    %c0_103 = arith.constant 0 : index
    %c0_104 = arith.constant 0 : index
    %82 = vector.load %arg5[%c0_103, %c0_104] : memref<216x125xf32, #tpu.memory_space<vmem>>, vector<216x125xf32>
    %cst = arith.constant dense<0.000000e+00> : vector<8x125xf32>
    %83 = tpu.matmul %81, %82, %cst {dimension_numbers = #tpu.dot_dimension_numbers<[1], [0], [0], [1], [0, 0, 1, 1], [], []>} : vector<8x216xf32>, vector<216x125xf32>, vector<8x125xf32> -> vector<8x125xf32>
    %c0_105 = arith.constant 0 : index
    %c0_106 = arith.constant 0 : index
    %84 = vector.load %arg3[%c0_105, %c0_106] : memref<8x1xf32, #tpu.memory_space<vmem>>, vector<8x1xf32>
    %85 = vector.broadcast %84 : vector<8x1xf32> to vector<8x125xf32>
    %86 = arith.addf %83, %85 : vector<8x125xf32>
    %c0_107 = arith.constant 0 : index
    %c0_108 = arith.constant 0 : index
    %c0_109 = arith.constant 0 : index
    %87 = vector.load %arg4[%c0_107, %c0_108, %c0_109] : memref<1x8x125xf32, #tpu.memory_space<vmem>>, vector<1x8x125xf32>
    %88 = vector.shape_cast %87 : vector<1x8x125xf32> to vector<8x125xf32>
    %89 = vector.shape_cast %86 : vector<8x125xf32> to vector<1x8x125xf32>
    tpu.vector_store %arg4[%c0_107, %c0_108, %c0_109], %89 {strides = array<i32>} : memref<1x8x125xf32, #tpu.memory_space<vmem>>, vector<1x8x125xf32>,
    return
  }
  func.func @transform_0(%arg0: i32) -> (i32, i32, i32) {
    %c0_i32 = arith.constant 0 : i32
    %c0_i32_0 = arith.constant 0 : i32
    %c0_i32_1 = arith.constant 0 : i32
    return %arg0, %c0_i32, %c0_i32_0 : i32, i32, i32
  }
  func.func @transform_1(%arg0: i32) -> (i32, i32) {
    %c0_i32 = arith.constant 0 : i32
    %c0_i32_0 = arith.constant 0 : i32
    %c0_i32_1 = arith.constant 0 : i32
    return %c0_i32, %c0_i32_0 : i32, i32
  }
  func.func @transform_2(%arg0: i32) -> (i32, i32) {
    %c0_i32 = arith.constant 0 : i32
    %c0_i32_0 = arith.constant 0 : i32
    %c0_i32_1 = arith.constant 0 : i32
    return %c0_i32, %c0_i32_0 : i32, i32
  }
  func.func @transform_3(%arg0: i32) -> (i32, i32, i32) {
    %c0_i32 = arith.constant 0 : i32
    %c0_i32_0 = arith.constant 0 : i32
    %c0_i32_1 = arith.constant 0 : i32
    return %arg0, %c0_i32, %c0_i32_0 : i32, i32, i32
  }
}

</mosaic_0001>

<bundles_post_ra>
// kernel: a_call__.3
= control target key start
LH: loop header
LB: loop body
LE: loop exit
PB: predicated region body
PF: predicated region fallthrough
CT: control target
= control target key end

     0   :  { %8 = vsyncpa [#allocation3], 0  ;;  %s591_s0 = inlined_call_operand.vmem [shape: f32[2,16,256], index: 0, kind: input, shape index: {}]   ;;  %s592_s1 = inlined_call_operand.hbm [shape: f32[1,16,256], index: 1, kind: input, shape index: {}]   ;;  %s593_s2 = inlined_call_operand.hbm [shape: f32[1,16,256], index: 2, kind: input, shape index: {}]   ;;  %s594_s3 = inlined_call_operand.vmem [shape: f32[2,16,256], index: 3, kind: output, shape index: {}]  }
   0x1   :  { %9 = vsyncpa [#allocation5], 0  ;;  %s491_s12 = smov 0  }
   0x2 LB: > { %s497_s13 = sadd.s32 4294967295, %s465_s12   ;;  %p347_p0 = scmp.ge.s32.totalorder %s465_s12, 1  ;;  %s465_s12 = sphi %s491_s12, %s15_s12  }
   0x3   : > { %p114_p1 = scmp.lt.s32.totalorder %s465_s12, 3  ;;  %s467_s14 = smov [#allocation2]  }
   0x4   : > { %s126_s15 = sshll.u32 %s467_s14, 4  ;;  %p595_p3 = scmp.eq.s32.totalorder %s497_s13, 0  ;;  %s127_s15 = int_to_ptr.vmem [resolvable:$true] %s126_s15 }
   0x5   : > { %p501_p2 = pnand %p347_p0, %p114_p1  ;;  %s468_s17 = smov [#allocation4]  }
   0x6   : > { %s139_s18 = sshll.u32 %s468_s17, 4  ;;  %s395_s22 = scalar_lea.hbm %s592_s1, 512  ;;  %s514_s18 = int_to_ptr.vmem [resolvable:$true] %s139_s18 }
   0x7   : > { %s597_s16 = scalar_select %p501_p2, 1, 0 }
   0x8   : > { %p370_p4 = pneg %p501_p2  ;;  %p396_p6 = scmp.ne.s32.totalorder %s592_s1, %s395_s22 }
   0x9   : > { %p402_p10 = scmp.lt.u32.totalorder %s395_s22, %s592_s1 }
   0xa   : > { %p510_p5 = pnand %p595_p3, %p370_p4 }
   0xc   : > { %p397_p7 = pneg %p510_p5 }
   0xe   : > { %p398_p8 = pnand %p397_p7, %p396_p6 }
  0x10   : > { %p399_p9 = pneg %p398_p8 }
  0x12   : > { %p404_p11 = pnand %p402_p10, %p399_p9 }
  0x14   : > { %407 = shalt.err (!%p404_p11)
}
  0x15   : > { %s408_s27 = scalar_lea.vmem %s127_s15, 512  ;;  %p416_p1 = scmp.lt.s32.totalorder %s127_s15, %s127_s15 }
  0x16   : > { %p409_p12 = scmp.ne.s32.totalorder %s127_s15, %s408_s27  ;;  %p417_p4 = scmp.lt.s32.totalorder %s408_s27, %s408_s27 }
  0x18   : > { %p411_p13 = pnand %p409_p12, %p397_p7  ;;  %p418_p3 = por %p417_p4, %p416_p1 }
  0x1a   : > { %p412_p0 = pneg %p411_p13 }
  0x1c   : > { %p419_p2 = pnand %p418_p3, %p412_p0 }
  0x1e   : > { %422 = shalt.err (!%p419_p2)
}
  0x1f   : > { %s469_s28 = smov 256   ;;  %s470_s29 = smov 16  }
  0x20   : > { %373 = dma.hbm_to_vmem [thread:$0]  (!%p510_p5), %s592_s1, 512, %s127_s15, [#allocation3], %s469_s28, %s469_s28, %s470_s29  }
  0x21   : > { %s423_s7 = scalar_lea.hbm %s593_s2, 512 }
  0x22   : > { %p424_p6 = scmp.ne.s32.totalorder %s593_s2, %s423_s7  ;;  %p430_p8 = scmp.lt.u32.totalorder %s423_s7, %s593_s2 }
  0x24   : > { %p426_p2 = pnand %p424_p6, %p397_p7 }
  0x26   : > { %p427_p3 = pneg %p426_p2 }
  0x28   : > { %p432_p9 = pnand %p430_p8, %p427_p3 }
  0x2a   : > { %435 = shalt.err (!%p432_p9)
}
  0x2b   : > { %s436_s14 = scalar_lea.vmem %s514_s18, 512  ;;  %p444_p13 = scmp.lt.s32.totalorder %s514_s18, %s514_s18 }
  0x2c   : > { %p437_p10 = scmp.ne.s32.totalorder %s514_s18, %s436_s14  ;;  %p445_p0 = scmp.lt.s32.totalorder %s436_s14, %s436_s14 }
  0x2e   : > { %p439_p11 = pnand %p437_p10, %p397_p7  ;;  %p446_p1 = por %p445_p0, %p444_p13 }
  0x30   : > { %p440_p12 = pneg %p439_p11 }
  0x32   : > { %p447_p4 = pnand %p446_p1, %p440_p12 }
  0x34   : > { %450 = shalt.err (!%p447_p4)
}
  0x35   : > { %376 = dma.hbm_to_vmem [thread:$0]  (!%p510_p5), %s593_s2, 512, %s514_s18, [#allocation5], %s469_s28, %s469_s28, %s470_s29  }
  0x36   : > { %p599_p6 = scmp.ne.s32.totalorder %s597_s16, 0 }
  0x37   : > { %p600_p2 = scmp.eq.s32.totalorder (!%p599_p6), %s497_s13, 0 }
  0x38   : > { %163 = sbr.rel (%p599_p6) target bundleno = 426 (0x1aa), region = 32 }
  0x3f   : > { %456 = dma.done.wait (%p600_p2), [#allocation3], 512   ;;  %p601_p7 = pmov %p600_p2 }
  0x40   : > { %p602_p3 = pmov %p600_p2 }
  0x41   : > { %458 = vsyncadd (%p601_p7), [#allocation3], 4294966784 }
  0x42   : > { %460 = dma.done.wait (%p602_p3), [#allocation5], 512   ;;  %p603_p8 = pmov %p600_p2 }
  0x43   : > { %p191_p9 = scmp.lt.s32.totalorder %s497_s13, 1  ;;  %v248_v37 = vld [vmem:[#allocation2] sm:$0xff]  ;;  %v249_v39 = vld [vmem:[#allocation2 + $0x8] sm:$0xff]  ;;  %v250_v40 = vld [vmem:[#allocation2 + $0x10] sm:$0xff] }
  0x44   : > { %462 = vsyncadd (%p603_p8), [#allocation5], 4294966784  ;;  %v251_v41 = vld [vmem:[#allocation2 + $0x18] sm:$0xff]  ;;  %v256_v42 = vld [vmem:[#allocation4] sm:$0xff] }
  0x45   : > { %s605_s13 = smov (!%p191_p9, %s497_s13), 1  ;;  %v257_v47 = vld [vmem:[#allocation4 + $0x8] sm:$0xff]  ;;  %v258_v48 = vld [vmem:[#allocation4 + $0x10] sm:$0xff]  ;;  %v259_v49 = vld [vmem:[#allocation4 + $0x18] sm:$0xff] }
  0x46   : > { %s360_s16 = sshll.u32 %s605_s13, 5 }
  0x47   : > { %s195_s20 = scalar_lea.vmem %s591_s0, %s360_s16  ;;  %s200_s23 = scalar_lea.vmem %s594_s3, %s360_s16 }
  0x48   : > { %v201_v0 = vld [vmem:[%s195_s20] sm:$0xff]  ;;  %v202_v1 = vld [vmem:[%s195_s20 + $0x8] sm:$0xff]  ;;  %v203_v2 = vld [vmem:[%s195_s20 + $0x10] sm:$0xff] }
  0x49   : > { %v205_v3 = vadd.f32 %v202_v1, %v201_v0  ;;  %v204_v4 = vld [vmem:[%s195_s20 + $0x18] sm:$0xff] }
  0x4a   : > { %v208_v5 = vadd.f32 %v204_v4, %v203_v2 }
  0x4b   : > { %206 = vadd.xlane.f32.xlu0 %v205_v3 }
  0x4f   : > { %209 = vadd.xlane.f32.xlu0 %v208_v5 }
  0xd8   : > { %v207_v6 = vpop.xlane.xlu0 %206 }
  0xdc   : > { %v210_v7 = vpop.xlane.xlu0 %209 }
  0xdd   : > { %v211_v8 = vadd.f32 %v210_v7, %v207_v6 }
  0xdf   : > { %v212_v9 = vrot.slane %v211_v8, 4 }
  0xe1   : > { %v213_v10 = vadd.f32 %v212_v9, %v211_v8 }
  0xe3   : > { %v214_v11 = vrot.slane %v213_v10, 2 }
  0xe5   : > { %v215_v12 = vadd.f32 %v214_v11, %v213_v10 }
  0xe7   : > { %v216_v13 = vrot.slane %v215_v12, 1 }
  0xe9   : > { %v217_v14 = vadd.f32 %v216_v13, %v215_v12 }
  0xeb   : > { %v219_v15 = vmul.f32 0.00024414063, %v217_v14 }
  0xed   : > { %v220_v16 = vsub.f32 %v201_v0, %v219_v15  ;;  %v221_v17 = vsub.f32 %v202_v1, %v219_v15  ;;  %v222_v18 = vsub.f32 %v203_v2, %v219_v15  ;;  %v223_v19 = vsub.f32 %v204_v4, %v219_v15 }
  0xef   : > { %v224_v20 = vmul.f32 %v220_v16, %v220_v16  ;;  %v225_v21 = vmul.f32 %v221_v17, %v221_v17  ;;  %v226_v23 = vmul.f32 %v222_v18, %v222_v18  ;;  %v227_v24 = vmul.f32 %v223_v19, %v223_v19 }
  0xf1   : > { %v228_v22 = vadd.f32 %v225_v21, %v224_v20  ;;  %v231_v25 = vadd.f32 %v227_v24, %v226_v23 }
  0xf3   : > { %229 = vadd.xlane.f32.xlu1 %v228_v22 }
  0xf7   : > { %232 = vadd.xlane.f32.xlu1 %v231_v25 }
 0x180   : > { %v230_v26 = vpop.xlane.xlu1 %229 }
 0x184   : > { %v233_v27 = vpop.xlane.xlu1 %232 }
 0x185   : > { %v234_v28 = vadd.f32 %v233_v27, %v230_v26 }
 0x187   : > { %v235_v29 = vrot.slane %v234_v28, 4 }
 0x189   : > { %v236_v30 = vadd.f32 %v235_v29, %v234_v28 }
 0x18b   : > { %v237_v31 = vrot.slane %v236_v30, 2 }
 0x18d   : > { %v238_v32 = vadd.f32 %v237_v31, %v236_v30 }
 0x18f   : > { %v239_v33 = vrot.slane %v238_v32, 1 }
 0x191   : > { %v240_v34 = vadd.f32 %v239_v33, %v238_v32 }
 0x193   : > { %v241_v35 = vmul.f32 0.00024414063, %v240_v34 }
 0x195   : > { %v242_v36 = vadd.f32 1e-05, %v241_v35 }
 0x197   : > { %393 = vrsqrt.f32 %v242_v36 }
 0x1a1   : > { %v394_v38 = vpop.eup %393 }
 0x1a2   : > { %v244_v43 = vmul.f32 %v394_v38, %v220_v16  ;;  %v245_v44 = vmul.f32 %v394_v38, %v221_v17  ;;  %v246_v45 = vmul.f32 %v394_v38, %v222_v18  ;;  %v247_v46 = vmul.f32 %v394_v38, %v223_v19 }
 0x1a4   : > { %v252_v50 = vmul.f32 %v248_v37, %v244_v43  ;;  %v253_v51 = vmul.f32 %v249_v39, %v245_v44  ;;  %v254_v52 = vmul.f32 %v250_v40, %v246_v45  ;;  %v255_v53 = vmul.f32 %v251_v41, %v247_v46 }
 0x1a6   : > { %v260_v54 = vadd.f32 %v256_v42, %v252_v50  ;;  %v261_v55 = vadd.f32 %v257_v47, %v253_v51  ;;  %v262_v56 = vadd.f32 %v258_v48, %v254_v52  ;;  %v263_v57 = vadd.f32 %v259_v49, %v255_v53 }
 0x1a8   : > { %264 = vst [vmem:[%s200_s23] sm:$0xff] %v260_v54  ;;  %265 = vst [vmem:[%s200_s23 + $0x8] sm:$0xff] %v261_v55 }
 0x1a9   : > { %266 = vst [vmem:[%s200_s23 + $0x10] sm:$0xff] %v262_v56  ;;  %267 = vst [vmem:[%s200_s23 + $0x18] sm:$0xff] %v263_v57 }
 0x1aa PF: > { %s15_s12 = sadd.s32 1, %s465_s12  }
 0x1ab   : > { %p12_p5 = scmp.ge.s32.totalorder %s15_s12, 4  }
 0x1ad   :  { %14 = sbr.rel (!%p12_p5) target bundleno = 2 (0x2), region = 71 }
 0x1b4   :  { %289 = vsyncpa [#allocation3], 1 }
 0x1b5   :  { %291 = vsyncpa [#allocation3 + $0x1], 1 }
 0x1b6   :  { %292 = vsyncpa [#allocation5], 1 }

// kernel: a_call__.4
= control target key start
LH: loop header
LB: loop body
LE: loop exit
PB: predicated region body
PF: predicated region fallthrough
CT: control target
= control target key end

     0   :  { %s939_s12 = smov 0   ;;  %s1180_s0 = inlined_call_operand.vmem [shape: f32[2,8,820], index: 0, kind: input, shape index: {}]   ;;  %s1181_s1 = inlined_call_operand.vmem [shape: f32[8,27], index: 1, kind: input, shape index: {}]   ;;  %s1182_s2 = inlined_call_operand.vmem [shape: f32[8,1], index: 2, kind: input, shape index: {}]   ;;  %s1183_s3 = inlined_call_operand.vmem [shape: f32[2,8,729], index: 3, kind: output, shape index: {}]  }
   0x1 LB: > { %s793_s13 = sadd.s32 4294967295, %s907_s12   ;;  %p797_p0 = scmp.ge.s32.totalorder %s907_s12, 1  ;;  %s907_s12 = sphi %s939_s12, %s13_s12  }
   0x2   : > { %p137_p1 = scmp.lt.s32.totalorder %s907_s12, 3 }
   0x4   : > { %p138_p2 = pnand %p797_p0, %p137_p1 }
   0x5   : > { %p161_p3 = scmp.lt.s32.totalorder (!%p138_p2), %s793_s13, 1  ;;  %s909_s18 = smov (!%p138_p2), 119   ;;  %v174_v23 = vlaneseq (!%p138_p2)  ;;  %vm233_vm1 = vcmask (!%p138_p2), 973824   ;;  %vm194_vm2 = vcmask (!%p138_p2), 1039360   ;;  %vm258_vm3 = vcmask (!%p138_p2), 965632  }
   0x6   : > { %141 = sbr.rel (%p138_p2) target bundleno = 415 (0x19f), region = 32  ;;  %s910_s19 = smov (!%p138_p2), 127   ;;  %vm359_vm4 = vcmask (!%p138_p2), 384000   ;;  %vm384_vm5 = vcmask (!%p138_p2), 375808   ;;  %vm433_vm6 = vcmask (!%p138_p2), 310272   ;;  %vm458_vm7 = vcmask (!%p138_p2), 302080  }
   0x7   : > { %s911_s20 = smov (!%p138_p2), 118   ;;  %vm978_vm0 = vcmp.lt.s32.totalorder (!%p138_p2), %v174_v23, 729  ;;  %s912_s21 = smov (!%p138_p2), 47   ;;  %vm499_vm8 = vcmask (!%p138_p2), 1042432   ;;  %vm918_vm9 = vmmov (!%p138_p2), 1   ;;  %vm495_vm11 = vcmask (!%p138_p2), 220160  }
   0x8   : > { %s913_s22 = smov (!%p138_p2), 46   ;;  %s914_s23 = smov (!%p138_p2), 38   ;;  %vm1150_vm10 = vmpackc.low (!%p138_p2), %vm499_vm8, %vm918_vm9  ;;  %vm736_vm12 = vcmask (!%p138_p2), 728064  }
   0x9   : > { %s915_s24 = smov (!%p138_p2), 37  }
   0xd   : > { %s1189_s13 = smov (!%p161_p3, %s793_s13), 1 }
   0xe   : > { %s879_s14 = smul.u32 56, %s1189_s13 }
   0xf   : > { %s880_s29 = smul.u32 48, %s1189_s13 }
  0x10   : > { %s953_s17 = scalar_lea.vmem %s1180_s0, %s879_s14 }
  0x11   : > { %v226_v0 = vld [vmem:[%s953_s17] ss:$8 sm:$0xf]  ;;  %v808_v6 = vld [vmem:[%s953_s17 + $0x1] ss:$8 sm:$0xf]  ;;  %s170_s5 = scalar_lea.vmem %s1183_s3, %s880_s29 }
  0x12   : > { %v227_v1 = vld [vmem:[%s953_s17] ss:$8 sm:$0x30]  ;;  %v809_v7 = vld [vmem:[%s953_s17 + $0x1] ss:$8 sm:$0x30] }
  0x13   : > { %v228_v2 = vor.u32 %v227_v1, %v226_v0  ;;  %v187_v3 = vld [vmem:[%s953_s17] ss:$8 sm:$0xf]  ;;  %v241_v8 = vor.u32 %v809_v7, %v808_v6  ;;  %v806_v9 = vld [vmem:[%s953_s17 + $0x2] ss:$8 sm:$0xf] }
  0x14   : > { %v188_v4 = vld [vmem:[%s953_s17] ss:$8 sm:$0x30]  ;;  %v807_v10 = vld [vmem:[%s953_s17 + $0x2] ss:$8 sm:$0x30] }
  0x15   : > { %v189_v5 = vor.u32 %v188_v4, %v187_v3  ;;  %230 = vrot.lane.b32.xlu1 %v228_v2, %s909_s18  ;;  %v216_v11 = vor.u32 %v807_v10, %v806_v9  ;;  %v814_v12 = vld [vmem:[%s953_s17 + $0x4] ss:$8 sm:$0xf]  ;;  %v251_v14 = vld [vmem:[%s953_s17] ss:$8 sm:$0xf] }
  0x16   : > { %v815_v13 = vld [vmem:[%s953_s17 + $0x4] ss:$8 sm:$0x30]  ;;  %v252_v15 = vld [vmem:[%s953_s17] ss:$8 sm:$0x30] }
  0x17   : > { %191 = vrot.lane.b32.xlu0 %v189_v5, %s910_s19  ;;  %v280_v16 = vor.u32 %v815_v13, %v814_v12  ;;  %v253_v17 = vor.u32 %v252_v15, %v251_v14  ;;  %v822_v18 = vld [vmem:[%s953_s17 + $0x4] ss:$8 sm:$0xf]  ;;  %v820_v20 = vld [vmem:[%s953_s17 + $0x6] ss:$8 sm:$0xf] }
  0x18   : > { %v823_v19 = vld [vmem:[%s953_s17 + $0x4] ss:$8 sm:$0x30]  ;;  %v821_v21 = vld [vmem:[%s953_s17 + $0x6] ss:$8 sm:$0x30] }
  0x19   : > { %243 = vrot.lane.b32.xlu1 %v241_v8, %s909_s18  ;;  %v318_v22 = vor.u32 %v823_v19, %v822_v18  ;;  %v306_v24 = vor.u32 %v821_v21, %v820_v20  ;;  %v826_v25 = vld [vmem:[%s953_s17 + $0x4] ss:$8 sm:$0xf]  ;;  %v824_v27 = vld [vmem:[%s953_s17 + $0x5] ss:$8 sm:$0xf] }
  0x1a   : > { %v827_v26 = vld [vmem:[%s953_s17 + $0x4] ss:$8 sm:$0x30]  ;;  %v825_v28 = vld [vmem:[%s953_s17 + $0x5] ss:$8 sm:$0x30] }
  0x1b   : > { %218 = vrot.lane.b32.xlu0 %v216_v11, %s910_s19  ;;  %v342_v29 = vor.u32 %v827_v26, %v826_v25  ;;  %v330_v31 = vor.u32 %v825_v28, %v824_v27  ;;  %v828_v32 = vld [vmem:[%s953_s17 + $0x1] ss:$8 sm:$0xf]  ;;  %v352_v34 = vld [vmem:[%s953_s17] ss:$8 sm:$0xf] }
  0x1c   : > { %v829_v33 = vld [vmem:[%s953_s17 + $0x1] ss:$8 sm:$0x70]  ;;  %v353_v35 = vld [vmem:[%s953_s17] ss:$8 sm:$0x70] }
  0x1d   : > { %282 = vrot.lane.b32.xlu1 %v280_v16, %s910_s19  ;;  %v830_v36 = vld [vmem:[%s953_s17 + $0x2] ss:$8 sm:$0xf]  ;;  %v367_v38 = vor.u32 %v829_v33, %v828_v32  ;;  %v377_v39 = vld [vmem:[%s953_s17] ss:$8 sm:$0xf]  ;;  %v354_v42 = vor.u32 %v353_v35, %v352_v34 }
  0x1e   : > { %v831_v37 = vld [vmem:[%s953_s17 + $0x2] ss:$8 sm:$0x70]  ;;  %v378_v40 = vld [vmem:[%s953_s17] ss:$8 sm:$0x70] }
  0x1f   : > { %255 = vrot.lane.b32.xlu0 %v253_v17, %s911_s20  ;;  %v171_v41 = vld [vmem:[%s953_s17] ss:$8 sm:$0xf]  ;;  %v800_v44 = vld [vmem:[%s953_s17 + $0x1] ss:$8 sm:$0xf]  ;;  %v392_v53 = vor.u32 %v831_v37, %v830_v36  ;;  %v379_v59 = vor.u32 %v378_v40, %v377_v39 }
  0x20   : > { %v172_v43 = vld [vmem:[%s953_s17] ss:$8 sm:$0x30]  ;;  %v801_v46 = vld [vmem:[%s953_s17 + $0x1] ss:$8 sm:$0x30] }
  0x21   : > { %320 = vrot.lane.b32.xlu1 %v318_v22, %s909_s18  ;;  %v173_v45 = vor.u32 %v172_v43, %v171_v41  ;;  %v802_v47 = vld [vmem:[%s953_s17 + $0x2] ss:$8 sm:$0xf]  ;;  %v183_v50 = vor.u32 %v801_v46, %v800_v44  ;;  %v804_v52 = vld [vmem:[%s953_s17 + $0x3] ss:$8 sm:$0xf] }
  0x22   : > { %v834_v48 = vld [vmem:[%s953_s17 + $0x2] ss:$8 sm:$0xf]  ;;  %v832_v54 = vld [vmem:[%s953_s17 + $0x3] ss:$8 sm:$0xf] }
  0x23   : > { %308 = vrot.lane.b32.xlu0 %v306_v24, %s910_s19  ;;  %v835_v49 = vld [vmem:[%s953_s17 + $0x2] ss:$8 sm:$0x70]  ;;  %v833_v55 = vld [vmem:[%s953_s17 + $0x3] ss:$8 sm:$0x70] }
  0x24   : > { %v803_v51 = vld [vmem:[%s953_s17 + $0x2] ss:$8 sm:$0x30]  ;;  %178 = vst.msk [vmem:[#allocation2] ss:$8 sm:$0xf] %vm978_vm0, %v173_v45  ;;  %v416_v5 = vor.u32 %v835_v49, %v834_v48  ;;  %v404_v8 = vor.u32 %v833_v55, %v832_v54 }
  0x25   : > { %344 = vrot.lane.b32.xlu1 %v342_v29, %s911_s20  ;;  %v203_v56 = vor.u32 %v803_v51, %v802_v47  ;;  %v805_v57 = vld [vmem:[%s953_s17 + $0x3] ss:$8 sm:$0x30]  ;;  %v810_v58 = vld [vmem:[%s953_s17 + $0x4] ss:$8 sm:$0xf] }
  0x26   : > { %179 = vst.msk [vmem:[#allocation2] ss:$8 sm:$0x30] %vm978_vm0, %v173_v45  ;;  %185 = vst.msk [vmem:[#allocation2 + $0x1] ss:$8 sm:$0xf] %vm978_vm0, %v183_v50  ;;  %v210_v60 = vor.u32 %v805_v57, %v804_v52 }
  0x27   : > { %332 = vrot.lane.b32.xlu0 %v330_v31, %s909_s18  ;;  %v811_v61 = vld [vmem:[%s953_s17 + $0x4] ss:$8 sm:$0x30]  ;;  %v812_v62 = vld [vmem:[%s953_s17 + $0x5] ss:$8 sm:$0xf] }
  0x28   : > { %186 = vst.msk [vmem:[#allocation2 + $0x1] ss:$8 sm:$0x30] %vm978_vm0, %v183_v50  ;;  %205 = vst.msk [vmem:[#allocation2 + $0x3] ss:$8 sm:$0xf] %vm978_vm0, %v203_v56  ;;  %v267_v63 = vor.u32 %v811_v61, %v810_v58 }
  0x29   : > { %369 = vrot.lane.b32.xlu1 %v367_v38, %s912_s21  ;;  %v813_v0 = vld [vmem:[%s953_s17 + $0x5] ss:$8 sm:$0x30]  ;;  %v816_v1 = vld [vmem:[%s953_s17 + $0x6] ss:$8 sm:$0xf] }
  0x2a   : > { %206 = vst.msk [vmem:[#allocation2 + $0x3] ss:$8 sm:$0x30] %vm978_vm0, %v203_v56  ;;  %212 = vst.msk [vmem:[#allocation2 + $0x4] ss:$8 sm:$0xf] %vm978_vm0, %v210_v60  ;;  %v274_v2 = vor.u32 %v813_v0, %v812_v62 }
  0x2b   : > { %356 = vrot.lane.b32.xlu0 %v354_v42, %s912_s21  ;;  %v817_v3 = vld [vmem:[%s953_s17 + $0x6] ss:$8 sm:$0x30]  ;;  %v818_v4 = vld [vmem:[%s953_s17 + $0x7] ss:$8 sm:$0xf] }
  0x2c   : > { %213 = vst.msk [vmem:[#allocation2 + $0x4] ss:$8 sm:$0x30] %vm978_vm0, %v210_v60  ;;  %269 = vst.msk [vmem:[#allocation2 + $0x31] ss:$8 sm:$0xf] %vm978_vm0, %v267_v63  ;;  %v293_v6 = vor.u32 %v817_v3, %v816_v1 }
  0x2d   : > { %394 = vrot.lane.b32.xlu1 %v392_v53, %s912_s21  ;;  %v819_v7 = vld [vmem:[%s953_s17 + $0x7] ss:$8 sm:$0x30]  ;;  %270 = vst.msk [vmem:[#allocation2 + $0x31] ss:$8 sm:$0x30] %vm978_vm0, %v267_v63 }
  0x2e   : > { %v836_v9 = vld [vmem:[%s953_s17 + $0x1] ss:$8 sm:$0xf]  ;;  %276 = vst.msk [vmem:[#allocation2 + $0x32] ss:$8 sm:$0xf] %vm978_vm0, %v274_v2  ;;  %v300_v11 = vor.u32 %v819_v7, %v818_v4 }
  0x2f   : > { %381 = vrot.lane.b32.xlu0 %v379_v59, %s913_s22  ;;  %v837_v10 = vld [vmem:[%s953_s17 + $0x1] ss:$8 sm:$0x70]  ;;  %277 = vst.msk [vmem:[#allocation2 + $0x32] ss:$8 sm:$0x30] %vm978_vm0, %v274_v2 }
  0x30   : > { %v426_v12 = vld [vmem:[%s953_s17] ss:$8 sm:$0xf]  ;;  %295 = vst.msk [vmem:[#allocation2 + $0x34] ss:$8 sm:$0xf] %vm978_vm0, %v293_v6  ;;  %v441_v14 = vor.u32 %v837_v10, %v836_v9 }
  0x31   : > { %v427_v13 = vld [vmem:[%s953_s17] ss:$8 sm:$0x70]  ;;  %296 = vst.msk [vmem:[#allocation2 + $0x34] ss:$8 sm:$0x30] %vm978_vm0, %v293_v6  ;;  %418 = vrot.lane.b32.xlu1 %v416_v5, %s913_s22 }
  0x32   : > { %302 = vst.msk [vmem:[#allocation2 + $0x35] ss:$8 sm:$0xf] %vm978_vm0, %v300_v11  ;;  %303 = vst.msk [vmem:[#allocation2 + $0x35] ss:$8 sm:$0x30] %vm978_vm0, %v300_v11  ;;  %v428_v15 = vor.u32 %v427_v13, %v426_v12 }
  0x33   : > { %406 = vrot.lane.b32.xlu0 %v404_v8, %s912_s21  ;;  %v451_v16 = vld [vmem:[%s953_s17] ss:$8 sm:$0xf]  ;;  %v916_v19 = vmov 0.0   ;;  %v917_v21 = vmov 0  }
  0x34   : > { %v452_v17 = vld [vmem:[%s953_s17] ss:$8 sm:$0x70]  ;;  %582 = vmatprep.mubr.f32.mxu0 %v916_v19  ;;  %653 = vmatprep.mubr.f32.mxu1 %v916_v19 }
  0x35   : > { %443 = vrot.lane.b32.xlu1 %v441_v14, %s914_s23  ;;  %v453_v18 = vor.u32 %v452_v17, %v451_v16  ;;  %v489_v20 = vld [vmem:[%s1182_s2] sm:$0xff]  ;;  %900 = vset.pattern.permute.xlu0 %v917_v21 }
  0x36   : > { %899 = vset.pattern.permute.xlu1 %v917_v21 }
  0x37   : > { %430 = vrot.lane.b32.xlu0 %v428_v15, %s914_s23 }
  0x39   : > { %492 = vperm.xlu1 %899, %v489_v20  }
  0x3b   : > { %455 = vrot.lane.b32.xlu0 %v453_v18, %s915_s24 }
  0x87   : > { %v231_v22 = vpop.permute.xlu1 %230 }
  0x88   : > { %v232_v23 = vrot.slane %v231_v22, 1 }
  0x89   : > { %v192_v24 = vpop.permute.xlu0 %191 }
  0x8a   : > { %v193_v25 = vrot.slane %v192_v24, 1  ;;  %v234_v26 = vsel %vm233_vm1, %v231_v22, %v232_v23 }
  0x8b   : > { %237 = vst.msk [vmem:[#allocation2 + $0x6] ss:$8 sm:$0xf] %vm978_vm0, %v234_v26  ;;  %238 = vst.msk [vmem:[#allocation2 + $0x6] ss:$8 sm:$0x30] %vm978_vm0, %v234_v26  ;;  %v244_v28 = vpop.permute.xlu1 %243 }
  0x8c   : > { %v195_v27 = vsel %vm194_vm2, %v192_v24, %v193_v25  ;;  %v245_v29 = vrot.slane %v244_v28, 1 }
  0x8d   : > { %198 = vst.msk [vmem:[#allocation2 + $0x2] ss:$8 sm:$0xf] %vm978_vm0, %v195_v27  ;;  %199 = vst.msk [vmem:[#allocation2 + $0x2] ss:$8 sm:$0x30] %vm978_vm0, %v195_v27  ;;  %v219_v31 = vpop.permute.xlu0 %218 }
  0x8e   : > { %v220_v32 = vrot.slane %v219_v31, 1  ;;  %v246_v33 = vsel %vm233_vm1, %v244_v28, %v245_v29 }
  0x8f   : > { %249 = vst.msk [vmem:[#allocation2 + $0x7] ss:$8 sm:$0xf] %vm978_vm0, %v246_v33  ;;  %250 = vst.msk [vmem:[#allocation2 + $0x7] ss:$8 sm:$0x30] %vm978_vm0, %v246_v33  ;;  %v283_v35 = vpop.permute.xlu1 %282 }
  0x90   : > { %v221_v34 = vsel %vm194_vm2, %v219_v31, %v220_v32  ;;  %v284_v36 = vrot.slane %v283_v35, 1 }
  0x91   : > { %224 = vst.msk [vmem:[#allocation2 + $0x5] ss:$8 sm:$0xf] %vm978_vm0, %v221_v34  ;;  %225 = vst.msk [vmem:[#allocation2 + $0x5] ss:$8 sm:$0x30] %vm978_vm0, %v221_v34  ;;  %v256_v37 = vpop.permute.xlu0 %255 }
  0x92   : > { %v257_v38 = vrot.slane %v256_v37, 1  ;;  %v285_v39 = vsel %vm194_vm2, %v283_v35, %v284_v36 }
  0x93   : > { %288 = vst.msk [vmem:[#allocation2 + $0x33] ss:$8 sm:$0xf] %vm978_vm0, %v285_v39  ;;  %289 = vst.msk [vmem:[#allocation2 + $0x33] ss:$8 sm:$0x30] %vm978_vm0, %v285_v39  ;;  %v321_v41 = vpop.permute.xlu1 %320 }
  0x94   : > { %v259_v40 = vsel %vm258_vm3, %v256_v37, %v257_v38  ;;  %v322_v42 = vrot.slane %v321_v41, 1 }
  0x95   : > { %262 = vst.msk [vmem:[#allocation2 + $0x30] ss:$8 sm:$0xf] %vm978_vm0, %v259_v40  ;;  %263 = vst.msk [vmem:[#allocation2 + $0x30] ss:$8 sm:$0x30] %vm978_vm0, %v259_v40  ;;  %v309_v43 = vpop.permute.xlu0 %308 }
  0x96   : > { %v310_v44 = vrot.slane %v309_v43, 1  ;;  %v323_v45 = vsel %vm233_vm1, %v321_v41, %v322_v42 }
  0x97   : > { %326 = vst.msk [vmem:[#allocation2 + $0x37] ss:$8 sm:$0xf] %vm978_vm0, %v323_v45  ;;  %327 = vst.msk [vmem:[#allocation2 + $0x37] ss:$8 sm:$0x30] %vm978_vm0, %v323_v45  ;;  %v345_v47 = vpop.permute.xlu1 %344 }
  0x98   : > { %v311_v46 = vsel %vm194_vm2, %v309_v43, %v310_v44  ;;  %v346_v48 = vrot.slane %v345_v47, 1  ;;  %v466_v58 = vld [vmem:[#allocation2 + $0x8] sm:$0xff]  ;;  %v468_v59 = vld [vmem:[#allocation2 + $0x18] sm:$0xff]  ;;  %v465_v60 = vld [vmem:[#allocation2] sm:$0xff] }
  0x99   : > { %314 = vst.msk [vmem:[#allocation2 + $0x36] ss:$8 sm:$0xf] %vm978_vm0, %v311_v46  ;;  %315 = vst.msk [vmem:[#allocation2 + $0x36] ss:$8 sm:$0x30] %vm978_vm0, %v311_v46  ;;  %v333_v49 = vpop.permute.xlu0 %332 }
  0x9a   : > { %v334_v50 = vrot.slane %v333_v49, 1  ;;  %v347_v51 = vsel %vm258_vm3, %v345_v47, %v346_v48  ;;  %v467_v7 = vld [vmem:[#allocation2 + $0x10] sm:$0xff]  ;;  %v470_v43 = vld [vmem:[#allocation2 + $0x28] sm:$0xff]  ;;  %v464_v46 = vld [vmem:[%s1181_s1] sm:$0xff] }
  0x9b   : > { %350 = vst.msk [vmem:[#allocation2 + $0x61] ss:$8 sm:$0xf] %vm978_vm0, %v347_v51  ;;  %351 = vst.msk [vmem:[#allocation2 + $0x61] ss:$8 sm:$0x30] %vm978_vm0, %v347_v51  ;;  %v370_v53 = vpop.permute.xlu1 %369 }
  0x9c   : > { %v335_v52 = vsel %vm233_vm1, %v333_v49, %v334_v50  ;;  %v371_v54 = vrot.slane %v370_v53, 1  ;;  %v469_v48 = vld [vmem:[#allocation2 + $0x20] sm:$0xff] }
  0x9d   : > { %338 = vst.msk [vmem:[#allocation2 + $0x60] ss:$8 sm:$0xf] %vm978_vm0, %v335_v52  ;;  %339 = vst.msk [vmem:[#allocation2 + $0x60] ss:$8 sm:$0x30] %vm978_vm0, %v335_v52  ;;  %v357_v55 = vpop.permute.xlu0 %356 }
  0x9e   : > { %v358_v56 = vrot.slane %v357_v55, 1  ;;  %v372_v57 = vsel %vm359_vm4, %v370_v53, %v371_v54 }
  0x9f   : > { %375 = vst.msk [vmem:[#allocation2 + $0x63] ss:$8 sm:$0xf] %vm978_vm0, %v372_v57  ;;  %376 = vst.msk [vmem:[#allocation2 + $0x63] ss:$8 sm:$0x30] %vm978_vm0, %v372_v57  ;;  %v395_v62 = vpop.permute.xlu1 %394 }
  0xa0   : > { %v360_v61 = vsel %vm359_vm4, %v357_v55, %v358_v56  ;;  %v472_v63 = vld [vmem:[#allocation2 + $0x38] sm:$0xff]  ;;  %v474_v0 = vld [vmem:[#allocation2 + $0x48] sm:$0xff]  ;;  %v471_v1 = vld [vmem:[#allocation2 + $0x30] sm:$0xff]  ;;  %v396_v2 = vrot.slane %v395_v62, 1 }
  0xa1   : > { %363 = vst.msk [vmem:[#allocation2 + $0x62] ss:$8 sm:$0xf] %vm978_vm0, %v360_v61  ;;  %364 = vst.msk [vmem:[#allocation2 + $0x62] ss:$8 sm:$0x30] %vm978_vm0, %v360_v61  ;;  %v382_v3 = vpop.permute.xlu0 %381  ;;  %v849_v4 = vpack.c.bf16 %v472_v63, %v466_v58  ;;  %v859_v5 = vpack.c.bf16 %v474_v0, %v468_v59  ;;  %v851_v6 = vpack.c.bf16 %v471_v1, %v465_v60 }
  0xa2   : > { %v473_v8 = vld [vmem:[#allocation2 + $0x40] sm:$0xff]  ;;  %v383_v9 = vrot.slane %v382_v3, 1  ;;  %v397_v11 = vsel %vm359_vm4, %v395_v62, %v396_v2  ;;  %v476_v31 = vld [vmem:[#allocation2 + $0x58] sm:$0xff]  ;;  %v475_v45 = vld [vmem:[#allocation2 + $0x50] sm:$0xff] }
  0xa3   : > { %v861_v10 = vpack.c.bf16 %v473_v8, %v467_v7  ;;  %850 = vmatprep.subr.bf16.mxu0 %v849_v4  ;;  %860 = vmatprep.subr.bf16.mxu1 %v859_v5  ;;  %400 = vst.msk [vmem:[#allocation2 + $0x65] ss:$8 sm:$0xf] %vm978_vm0, %v397_v11  ;;  %401 = vst.msk [vmem:[#allocation2 + $0x65] ss:$8 sm:$0x30] %vm978_vm0, %v397_v11  ;;  %v419_v13 = vpop.permute.xlu1 %418  ;;  %v869_v44 = vpack.c.bf16 %v476_v31, %v470_v43 }
  0xa4   : > { %v385_v12 = vsel %vm384_vm5, %v382_v3, %v383_v9  ;;  %852 = vmatpush1.bf16.msra.mxu0 %v851_v6  ;;  %v420_v14 = vrot.slane %v419_v13, 1  ;;  %v871_v49 = vpack.c.bf16 %v475_v45, %v469_v48 }
  0xa5   : > { %862 = vmatpush1.bf16.msra.mxu1 %v861_v10  ;;  %388 = vst.msk [vmem:[#allocation2 + $0x64] ss:$8 sm:$0xf] %vm978_vm0, %v385_v12  ;;  %389 = vst.msk [vmem:[#allocation2 + $0x64] ss:$8 sm:$0x30] %vm978_vm0, %v385_v12  ;;  %v407_v15 = vpop.permute.xlu0 %406 }
  0xa6   : > { %v408_v16 = vrot.slane %v407_v15, 1  ;;  %v421_v17 = vsel %vm384_vm5, %v419_v13, %v420_v14 }
  0xa7   : > { %424 = vst.msk [vmem:[#allocation2 + $0x67] ss:$8 sm:$0xf] %vm978_vm0, %v421_v17  ;;  %425 = vst.msk [vmem:[#allocation2 + $0x67] ss:$8 sm:$0x30] %vm978_vm0, %v421_v17  ;;  %v444_v20 = vpop.permute.xlu1 %443 }
  0xa8   : > { %v409_v18 = vsel %vm359_vm4, %v407_v15, %v408_v16  ;;  %v445_v22 = vrot.slane %v444_v20, 1 }
  0xa9   : > { %412 = vst.msk [vmem:[#allocation2 + $0x66] ss:$8 sm:$0xf] %vm978_vm0, %v409_v18  ;;  %413 = vst.msk [vmem:[#allocation2 + $0x66] ss:$8 sm:$0x30] %vm978_vm0, %v409_v18  ;;  %v431_v21 = vpop.permute.xlu0 %430 }
  0xaa   : > { %v432_v23 = vrot.slane %v431_v21, 1  ;;  %v446_v24 = vsel %vm433_vm6, %v444_v20, %v445_v22 }
  0xab   : > { %449 = vst.msk [vmem:[#allocation2 + $0x91] ss:$8 sm:$0xf] %vm978_vm0, %v446_v24  ;;  %450 = vst.msk [vmem:[#allocation2 + $0x91] ss:$8 sm:$0x30] %vm978_vm0, %v446_v24 }
  0xac   : > { %v434_v25 = vsel %vm433_vm6, %v431_v21, %v432_v23 }
  0xad   : > { %437 = vst.msk [vmem:[#allocation2 + $0x90] ss:$8 sm:$0xf] %vm978_vm0, %v434_v25  ;;  %438 = vst.msk [vmem:[#allocation2 + $0x90] ss:$8 sm:$0x30] %vm978_vm0, %v434_v25  ;;  %v456_v26 = vpop.permute.xlu0 %455 }
  0xae   : > { %v457_v27 = vrot.slane %v456_v26, 1 }
  0xb0   : > { %v459_v28 = vsel %vm458_vm7, %v456_v26, %v457_v27  ;;  %v478_v32 = vld [vmem:[#allocation2 + $0x68] sm:$0xff]  ;;  %v480_v33 = vld [vmem:[#allocation2 + $0x78] sm:$0xff]  ;;  %v477_v34 = vld [vmem:[#allocation2 + $0x60] sm:$0xff] }
  0xb1   : > { %462 = vst.msk [vmem:[#allocation2 + $0x92] ss:$8 sm:$0xf] %vm978_vm0, %v459_v28  ;;  %463 = vst.msk [vmem:[#allocation2 + $0x92] ss:$8 sm:$0x30] %vm978_vm0, %v459_v28 }
  0xb2   : > { %v479_v41 = vld [vmem:[#allocation2 + $0x70] sm:$0xff]  ;;  %v482_v50 = vld [vmem:[#allocation2 + $0x88] sm:$0xff]  ;;  %v481_v53 = vld [vmem:[#allocation2 + $0x80] sm:$0xff] }
  0xb8   : > { %v484_v35 = vld [vmem:[#allocation2 + $0x98] sm:$0x7]  ;;  %v486_v36 = vld [vmem:[#allocation2 + $0xa8] sm:$0x7]  ;;  %v483_v37 = vld [vmem:[#allocation2 + $0x90] sm:$0x7]  ;;  %v493_v55 = vpop.permute.xlu1 %492 }
  0xb9   : > { %v853_v38 = vpack.c.bf16 %v484_v35, %v478_v32  ;;  %v863_v39 = vpack.c.bf16 %v486_v36, %v480_v33  ;;  %v856_v40 = vpack.c.bf16 %v483_v37, %v477_v34  ;;  %v485_v42 = vld [vmem:[#allocation2 + $0xa0] sm:$0x7]  ;;  %v488_v47 = vld [vmem:[#allocation2 + $0xb8] sm:$0x7]  ;;  %v487_v52 = vld [vmem:[#allocation2 + $0xb0] sm:$0x7] }
  0xba   : > { %v866_v30 = vpack.c.bf16 %v485_v42, %v479_v41  ;;  %v873_v51 = vpack.c.bf16 %v488_v47, %v482_v50  ;;  %v876_v54 = vpack.c.bf16 %v487_v52, %v481_v53 }
  0xbb   : > { %855 = vmatprep.subr.msk.bf16.mxu0 %vm1150_vm10, %v853_v38  ;;  %865 = vmatprep.subr.msk.bf16.mxu1 %vm1150_vm10, %v863_v39 }
  0xbc   : > { %858 = vmatpush1.bf16.msk.msra.mxu0 %vm1150_vm10, %v856_v40  ;;  %868 = vmatpush1.bf16.msk.msra.mxu1 %vm1150_vm10, %v866_v30 }
  0xbd   : > { %870 = vmatprep.subr.bf16.mxu0 %v869_v44 }
  0xbf   : > { %840 = vmatmul.mubr.msk.f32.vlgmr.msra.gmra.mrb[0].mxu0 %vm495_vm11, %v464_v46  ;;  %843 = vmatmul.mubr.msk.f32.vlgmr.msra.gmra.mrb[0].mxu1 %vm495_vm11, %v464_v46 }
  0xc0   : > { %872 = vmatpush1.bf16.msra.mxu0 %v871_v49  ;;  %724 = vmatprep.mubr.f32.mxu0 %v916_v19 }
  0xc1   : > { %875 = vmatprep.subr.msk.bf16.mxu0 %vm1150_vm10, %v873_v51 }
  0xc4   : > { %878 = vmatpush1.bf16.msk.msra.mxu0 %vm1150_vm10, %v876_v54 }
  0xc7   : > { %846 = vmatmul.mubr.msk.f32.vlgmr.msra.gmra.mrb[2].mxu0 %vm495_vm11, %v464_v46 }
 0x192   : > { %v584_v56 = vpop.f32.mrb[0].mxu0  ;;  %v655_v57 = vpop.f32.mrb[0].mxu1 }
 0x193   : > { %v585_v58 = vadd.f32 %v584_v56, %v493_v55  ;;  %v586_v19 = vpop.f32.mrb[1].mxu0  ;;  %v656_v59 = vadd.f32 %v655_v57, %v493_v55  ;;  %v657_v60 = vpop.f32.mrb[1].mxu1 }
 0x194   : > { %v587_v61 = vadd.f32 %v586_v19, %v493_v55  ;;  %v658_v62 = vadd.f32 %v657_v60, %v493_v55 }
 0x195   : > { %731 = vst [vmem:[%s170_s5] sm:$0xff] %v585_v58  ;;  %733 = vst [vmem:[%s170_s5 + $0x10] sm:$0xff] %v656_v59 }
 0x196   : > { %732 = vst [vmem:[%s170_s5 + $0x8] sm:$0xff] %v587_v61  ;;  %734 = vst [vmem:[%s170_s5 + $0x18] sm:$0xff] %v658_v62 }
 0x19a   : > { %v726_v63 = vpop.f32.mrb[2].mxu0 }
 0x19b   : > { %v727_v0 = vadd.f32 %v726_v63, %v493_v55  ;;  %v728_v1 = vpop.f32.mrb[3].mxu0 }
 0x19c   : > { %v729_v2 = vadd.f32 %v728_v1, %v493_v55 }
 0x19d   : > { %735 = vst [vmem:[%s170_s5 + $0x20] sm:$0xff] %v727_v0 }
 0x19e   : > { %737 = vst.msk [vmem:[%s170_s5 + $0x28] sm:$0xff] %vm736_vm12, %v729_v2 }
 0x19f PF: > { %s13_s12 = sadd.s32 1, %s907_s12  }
 0x1a0   : > { %p10_p4 = scmp.ge.s32.totalorder %s13_s12, 4  }
 0x1a2   :  { %12 = sbr.rel (!%p10_p4) target bundleno = 1 (0x1), region = 95 }

// kernel: a_call__.5
= control target key start
LH: loop header
LB: loop body
LE: loop exit
PB: predicated region body
PF: predicated region fallthrough
CT: control target
= control target key end

     0   :  { %s652_s12 = smov 0   ;;  %s773_s0 = inlined_call_operand.vmem [shape: f32[2,64,156], index: 0, kind: input, shape index: {}]   ;;  %s774_s1 = inlined_call_operand.vmem [shape: f32[8,216], index: 1, kind: input, shape index: {}]   ;;  %s775_s2 = inlined_call_operand.vmem [shape: f32[8,1], index: 2, kind: input, shape index: {}]   ;;  %s776_s3 = inlined_call_operand.vmem [shape: f32[2,8,125], index: 3, kind: output, shape index: {}]  }
   0x1 LB: > { %s544_s13 = sadd.s32 4294967295, %s620_s12   ;;  %p548_p0 = scmp.ge.s32.totalorder %s620_s12, 1  ;;  %s620_s12 = sphi %s652_s12, %s13_s12  }
   0x2   : > { %p137_p1 = scmp.lt.s32.totalorder %s620_s12, 3 }
   0x4   : > { %p138_p2 = pnand %p548_p0, %p137_p1 }
   0x5   : > { %p160_p3 = scmp.lt.s32.totalorder (!%p138_p2), %s544_s13, 1  ;;  %v622_v0 = vmov (!%p138_p2), 0.0|0.0   ;;  %vm170_vm0 = vcmask (!%p138_p2), 1022976   ;;  %s623_s18 = smov (!%p138_p2), 123   ;;  %v382_v18 = vld [vmem:[%s774_s1 + $0x8] sm:$0xff] (!%p138_p2)  ;;  %vm416_vm1 = vcmask (!%p138_p2), 719872  }
   0x6   : > { %141 = sbr.rel (%p138_p2) target bundleno = 423 (0x1a7), region = 32  ;;  %556 = vmatprep.subr.bf16.mxu0 (!%p138_p2), %v622_v0  ;;  %s624_s19 = smov (!%p138_p2), 127   ;;  %552 = vmatprep.mubr.msk.f32.mxu0 (!%p138_p2), %vm416_vm1, %v382_v18  ;;  %v630_v19 = vmov (!%p138_p2), 0   ;;  %v410_v20 = vld [vmem:[%s775_s2] sm:$0xff] (!%p138_p2)  ;;  %vm198_vm2 = vcmask (!%p138_p2), 1006592   ;;  %vm221_vm3 = vcmask (!%p138_p2), 998400  }
   0x7   : > { %s625_s20 = smov (!%p138_p2), 122   ;;  %s626_s21 = smov (!%p138_p2), 103   ;;  %613 = vset.pattern.permute.xlu0 (!%p138_p2), %v630_v19  ;;  %vm286_vm4 = vcmask (!%p138_p2), 842752   ;;  %vm309_vm5 = vcmask (!%p138_p2), 834560   ;;  %vm354_vm6 = vcmask (!%p138_p2), 801792   ;;  %vm377_vm7 = vcmask (!%p138_p2), 793600  }
   0x8   : > { %s627_s22 = smov (!%p138_p2), 102   ;;  %s628_s23 = smov (!%p138_p2), 98  }
   0x9   : > { %s629_s26 = smov (!%p138_p2), 97  }
   0xd   : > { %s778_s13 = smov (!%p160_p3, %s544_s13), 1 }
   0xe   : > { %s555_s14 = sshll.u32 %s778_s13, 7  ;;  %s551_s4 = sshll.u32 %s778_s13, 3 }
   0xf   : > { %s667_s17 = scalar_lea.vmem %s773_s0, %s555_s14  ;;  %s168_s7 = scalar_lea.vmem %s776_s3, %s551_s4 }
  0x10   : > { %v670_v1 = vld [vmem:[%s667_s17] sm:$0xff]  ;;  %v202_v3 = vld [vmem:[%s667_s17 + $0x10] sm:$0xff]  ;;  %v191_v4 = vld [vmem:[%s667_s17 + $0x8] sm:$0xff] }
  0x11   : > { %v184_v2 = vld [vmem:[%s667_s17 + $0x20] sm:$0xff]  ;;  %194 = vrot.lane.b32.xlu1 %v670_v1, %s623_s18  ;;  %176 = vrot.lane.b32.xlu0 %v670_v1, %s624_s19  ;;  %171 = vst.msk [vmem:[#allocation2] sm:$0xff] %vm170_vm0, %v670_v1  ;;  %173 = vst.msk [vmem:[#allocation2 + $0x8] sm:$0xff] %vm170_vm0, %v202_v3  ;;  %v256_v7 = vld [vmem:[%s667_s17 + $0x50] sm:$0xff] }
  0x12   : > { %181 = vst.msk [vmem:[#allocation2 + $0x18] sm:$0xff] %vm170_vm0, %v184_v2  ;;  %v245_v5 = vld [vmem:[%s667_s17 + $0x40] sm:$0xff]  ;;  %v324_v8 = vld [vmem:[%s667_s17 + $0x30] sm:$0xff]  ;;  %228 = vst.msk [vmem:[#allocation2 + $0x50] sm:$0xff] %vm170_vm0, %v256_v7 }
  0x13   : > { %v239_v6 = vld [vmem:[%s667_s17 + $0x60] sm:$0xff]  ;;  %226 = vst.msk [vmem:[#allocation2 + $0x48] sm:$0xff] %vm170_vm0, %v245_v5  ;;  %183 = vst.msk [vmem:[#allocation2 + $0x20] sm:$0xff] %vm170_vm0, %v324_v8  ;;  %v203_v9 = vld [vmem:[%s667_s17 + $0x18] sm:$0xff] }
  0x14   : > { %236 = vst.msk [vmem:[#allocation2 + $0x60] sm:$0xff] %vm170_vm0, %v239_v6  ;;  %v237_v11 = vld [vmem:[%s667_s17 + $0x70] sm:$0xff]  ;;  %v246_v14 = vld [vmem:[%s667_s17 + $0x48] sm:$0xff]  ;;  %v257_v15 = vld [vmem:[%s667_s17 + $0x58] sm:$0xff] }
  0x15   : > { %196 = vrot.lane.b32.xlu1 %v191_v4, %s623_s18  ;;  %186 = vrot.lane.b32.xlu0 %v184_v2, %s624_s19  ;;  %238 = vst.msk [vmem:[#allocation2 + $0x68] sm:$0xff] %vm170_vm0, %v237_v11  ;;  %v314_v16 = vld [vmem:[%s667_s17 + $0x28] sm:$0xff]  ;;  %v325_v17 = vld [vmem:[%s667_s17 + $0x38] sm:$0xff] }
  0x18   : > { %v383_v10 = vld [vmem:[#allocation2] sm:$0xff]  ;;  %v384_v12 = vld [vmem:[#allocation2 + $0x8] sm:$0xff] }
  0x19   : > { %208 = vrot.lane.b32.xlu1 %v203_v9, %s623_s18  ;;  %206 = vrot.lane.b32.xlu0 %v202_v3, %s623_s18  ;;  %v557_v13 = vpack.c.bf16 %v384_v12, %v383_v10  ;;  %v386_v26 = vld [vmem:[#allocation2 + $0x18] sm:$0xff]  ;;  %v393_v49 = vld [vmem:[#allocation2 + $0x50] sm:$0xff] }
  0x1a   : > { %v387_v32 = vld [vmem:[#allocation2 + $0x20] sm:$0xff]  ;;  %v392_v43 = vld [vmem:[#allocation2 + $0x48] sm:$0xff] }
  0x1b   : > { %558 = vmatpush1.bf16.msra.mxu0 %v557_v13  ;;  %v395_v55 = vld [vmem:[#allocation2 + $0x60] sm:$0xff] }
  0x1c   : > { %559 = vmatprep.subr.bf16.mxu0 %v622_v0  ;;  %v396_v56 = vld [vmem:[#allocation2 + $0x68] sm:$0xff] }
  0x1d   : > { %219 = vrot.lane.b32.xlu1 %v191_v4, %s625_s20  ;;  %217 = vrot.lane.b32.xlu0 %v670_v1, %s625_s20  ;;  %v575_v59 = vpack.c.bf16 %v396_v56, %v395_v55 }
  0x21   : > { %249 = vrot.lane.b32.xlu1 %v245_v5, %s623_s18  ;;  %231 = vrot.lane.b32.xlu0 %v245_v5, %s624_s19 }
  0x25   : > { %241 = vrot.lane.b32.xlu1 %v239_v6, %s624_s19  ;;  %251 = vrot.lane.b32.xlu0 %v246_v14, %s623_s18 }
  0x29   : > { %262 = vrot.lane.b32.xlu1 %v257_v15, %s623_s18  ;;  %260 = vrot.lane.b32.xlu0 %v256_v7, %s623_s18 }
  0x2d   : > { %273 = vrot.lane.b32.xlu1 %v246_v14, %s625_s20  ;;  %271 = vrot.lane.b32.xlu0 %v245_v5, %s625_s20 }
  0x31   : > { %284 = vrot.lane.b32.xlu1 %v191_v4, %s626_s21  ;;  %282 = vrot.lane.b32.xlu0 %v670_v1, %s626_s21 }
  0x35   : > { %296 = vrot.lane.b32.xlu1 %v203_v9, %s626_s21  ;;  %294 = vrot.lane.b32.xlu0 %v202_v3, %s626_s21 }
  0x39   : > { %307 = vrot.lane.b32.xlu1 %v191_v4, %s627_s22  ;;  %305 = vrot.lane.b32.xlu0 %v670_v1, %s627_s22 }
  0x3d   : > { %319 = vrot.lane.b32.xlu1 %v314_v16, %s626_s21  ;;  %317 = vrot.lane.b32.xlu0 %v184_v2, %s626_s21 }
  0x41   : > { %330 = vrot.lane.b32.xlu1 %v325_v17, %s626_s21  ;;  %328 = vrot.lane.b32.xlu0 %v324_v8, %s626_s21 }
  0x45   : > { %341 = vrot.lane.b32.xlu1 %v314_v16, %s627_s22  ;;  %339 = vrot.lane.b32.xlu0 %v184_v2, %s627_s22 }
  0x49   : > { %352 = vrot.lane.b32.xlu1 %v191_v4, %s628_s23  ;;  %350 = vrot.lane.b32.xlu0 %v670_v1, %s628_s23 }
  0x4d   : > { %364 = vrot.lane.b32.xlu1 %v203_v9, %s628_s23  ;;  %362 = vrot.lane.b32.xlu0 %v202_v3, %s628_s23 }
  0x51   : > { %375 = vrot.lane.b32.xlu1 %v191_v4, %s629_s26  ;;  %373 = vrot.lane.b32.xlu0 %v670_v1, %s629_s26 }
  0x55   : > { %413 = vperm.xlu0 %613, %v410_v20  }
  0x83   : > { %v195_v21 = vpop.permute.xlu1 %194  ;;  %v177_v22 = vpop.permute.xlu0 %176 }
  0x84   : > { %179 = vst.msk [vmem:[#allocation2 + $0x10] sm:$0xff] %vm170_vm0, %v177_v22 }
  0x87   : > { %v197_v23 = vpop.permute.xlu1 %196  ;;  %v187_v24 = vpop.permute.xlu0 %186 }
  0x88   : > { %v199_v25 = vsel %vm198_vm2, %v195_v21, %v197_v23  ;;  %189 = vst.msk [vmem:[#allocation2 + $0x28] sm:$0xff] %vm170_vm0, %v187_v24 }
  0x89   : > { %201 = vst.msk [vmem:[#allocation2 + $0x30] sm:$0xff] %vm170_vm0, %v199_v25 }
  0x8b   : > { %v209_v27 = vpop.permute.xlu1 %208  ;;  %v207_v28 = vpop.permute.xlu0 %206  ;;  %v385_v29 = vld [vmem:[#allocation2 + $0x10] sm:$0xff] }
  0x8c   : > { %v210_v30 = vsel %vm198_vm2, %v207_v28, %v209_v27  ;;  %v560_v31 = vpack.c.bf16 %v386_v26, %v385_v29 }
  0x8d   : > { %212 = vst.msk [vmem:[#allocation2 + $0x38] sm:$0xff] %vm170_vm0, %v210_v30 }
  0x8e   : > { %561 = vmatpush1.bf16.msra.mxu0 %v560_v31 }
  0x8f   : > { %v220_v33 = vpop.permute.xlu1 %219  ;;  %v218_v34 = vpop.permute.xlu0 %217  ;;  %562 = vmatprep.subr.bf16.mxu0 %v622_v0  ;;  %v388_v35 = vld [vmem:[#allocation2 + $0x28] sm:$0xff] }
  0x90   : > { %v222_v36 = vsel %vm221_vm3, %v218_v34, %v220_v33  ;;  %v563_v37 = vpack.c.bf16 %v388_v35, %v387_v32  ;;  %v389_v40 = vld [vmem:[#allocation2 + $0x30] sm:$0xff] }
  0x91   : > { %224 = vst.msk [vmem:[#allocation2 + $0x40] sm:$0xff] %vm170_vm0, %v222_v36 }
  0x92   : > { %564 = vmatpush1.bf16.msra.mxu0 %v563_v37 }
  0x93   : > { %v250_v38 = vpop.permute.xlu1 %249  ;;  %v232_v39 = vpop.permute.xlu0 %231  ;;  %565 = vmatprep.subr.bf16.mxu0 %v622_v0 }
  0x94   : > { %234 = vst.msk [vmem:[#allocation2 + $0x58] sm:$0xff] %vm170_vm0, %v232_v39  ;;  %v390_v41 = vld [vmem:[#allocation2 + $0x38] sm:$0xff] }
  0x95   : > { %v566_v42 = vpack.c.bf16 %v390_v41, %v389_v40 }
  0x97   : > { %v242_v44 = vpop.permute.xlu1 %241  ;;  %v252_v45 = vpop.permute.xlu0 %251  ;;  %567 = vmatpush1.bf16.msra.mxu0 %v566_v42 }
  0x98   : > { %244 = vst.msk [vmem:[#allocation2 + $0x70] sm:$0xff] %vm170_vm0, %v242_v44  ;;  %v253_v46 = vsel %vm198_vm2, %v250_v38, %v252_v45  ;;  %568 = vmatprep.subr.bf16.mxu0 %v622_v0  ;;  %v391_v47 = vld [vmem:[#allocation2 + $0x40] sm:$0xff] }
  0x99   : > { %255 = vst.msk [vmem:[#allocation2 + $0x78] sm:$0xff] %vm170_vm0, %v253_v46  ;;  %v569_v48 = vpack.c.bf16 %v392_v43, %v391_v47  ;;  %v631_v43 = vmov 0.0   ;;  %v381_v45 = vld [vmem:[%s774_s1] sm:$0xff] }
  0x9b   : > { %v263_v50 = vpop.permute.xlu1 %262  ;;  %v261_v51 = vpop.permute.xlu0 %260  ;;  %570 = vmatpush1.bf16.msra.mxu0 %v569_v48  ;;  %v394_v52 = vld [vmem:[#allocation2 + $0x58] sm:$0xff] }
  0x9c   : > { %v264_v53 = vsel %vm198_vm2, %v261_v51, %v263_v50  ;;  %571 = vmatprep.subr.bf16.mxu0 %v622_v0  ;;  %v572_v54 = vpack.c.bf16 %v394_v52, %v393_v49 }
  0x9d   : > { %266 = vst.msk [vmem:[#allocation2 + $0x80] sm:$0xff] %vm170_vm0, %v264_v53 }
  0x9f   : > { %v274_v57 = vpop.permute.xlu1 %273  ;;  %v272_v58 = vpop.permute.xlu0 %271  ;;  %573 = vmatpush1.bf16.msra.mxu0 %v572_v54  ;;  %v397_v61 = vld [vmem:[#allocation2 + $0x70] sm:$0xff] }
  0xa0   : > { %v275_v60 = vsel %vm221_vm3, %v272_v58, %v274_v57  ;;  %574 = vmatprep.subr.bf16.mxu0 %v622_v0  ;;  %v398_v62 = vld [vmem:[#allocation2 + $0x78] sm:$0xff] }
  0xa1   : > { %277 = vst.msk [vmem:[#allocation2 + $0x88] sm:$0xff] %vm170_vm0, %v275_v60  ;;  %v578_v3 = vpack.c.bf16 %v398_v62, %v397_v61 }
  0xa3   : > { %v285_v63 = vpop.permute.xlu1 %284  ;;  %v283_v1 = vpop.permute.xlu0 %282  ;;  %576 = vmatpush1.bf16.msra.mxu0 %v575_v59 }
  0xa4   : > { %v287_v2 = vsel %vm286_vm4, %v283_v1, %v285_v63  ;;  %577 = vmatprep.subr.bf16.mxu0 %v622_v0  ;;  %v399_v7 = vld [vmem:[#allocation2 + $0x80] sm:$0xff] }
  0xa5   : > { %289 = vst.msk [vmem:[#allocation2 + $0x90] sm:$0xff] %vm170_vm0, %v287_v2 }
  0xa7   : > { %v297_v4 = vpop.permute.xlu1 %296  ;;  %v295_v5 = vpop.permute.xlu0 %294  ;;  %579 = vmatpush1.bf16.msra.mxu0 %v578_v3 }
  0xa8   : > { %v298_v6 = vsel %vm286_vm4, %v295_v5, %v297_v4  ;;  %580 = vmatprep.subr.bf16.mxu0 %v622_v0  ;;  %v400_v8 = vld [vmem:[#allocation2 + $0x88] sm:$0xff] }
  0xa9   : > { %300 = vst.msk [vmem:[#allocation2 + $0x98] sm:$0xff] %vm170_vm0, %v298_v6  ;;  %v581_v9 = vpack.c.bf16 %v400_v8, %v399_v7 }
  0xab   : > { %v308_v10 = vpop.permute.xlu1 %307  ;;  %v306_v11 = vpop.permute.xlu0 %305  ;;  %582 = vmatpush1.bf16.msra.mxu0 %v581_v9 }
  0xac   : > { %v310_v12 = vsel %vm309_vm5, %v306_v11, %v308_v10  ;;  %583 = vmatprep.subr.bf16.mxu0 %v622_v0  ;;  %v401_v16 = vld [vmem:[#allocation2 + $0x90] sm:$0xff] }
  0xad   : > { %312 = vst.msk [vmem:[#allocation2 + $0xa0] sm:$0xff] %vm170_vm0, %v310_v12 }
  0xaf   : > { %v320_v13 = vpop.permute.xlu1 %319  ;;  %v318_v14 = vpop.permute.xlu0 %317 }
  0xb0   : > { %v321_v15 = vsel %vm286_vm4, %v318_v14, %v320_v13  ;;  %v402_v17 = vld [vmem:[#allocation2 + $0x98] sm:$0xff] }
  0xb1   : > { %323 = vst.msk [vmem:[#allocation2 + $0xa8] sm:$0xff] %vm170_vm0, %v321_v15  ;;  %v584_v18 = vpack.c.bf16 %v402_v17, %v401_v16 }
  0xb3   : > { %v331_v19 = vpop.permute.xlu1 %330  ;;  %v329_v20 = vpop.permute.xlu0 %328  ;;  %585 = vmatpush1.bf16.msra.mxu0 %v584_v18 }
  0xb4   : > { %v332_v21 = vsel %vm286_vm4, %v329_v20, %v331_v19  ;;  %586 = vmatprep.subr.bf16.mxu0 %v622_v0  ;;  %v403_v25 = vld [vmem:[#allocation2 + $0xa0] sm:$0xff] }
  0xb5   : > { %334 = vst.msk [vmem:[#allocation2 + $0xb0] sm:$0xff] %vm170_vm0, %v332_v21 }
  0xb7   : > { %v342_v22 = vpop.permute.xlu1 %341  ;;  %v340_v23 = vpop.permute.xlu0 %339 }
  0xb8   : > { %v343_v24 = vsel %vm309_vm5, %v340_v23, %v342_v22  ;;  %v404_v26 = vld [vmem:[#allocation2 + $0xa8] sm:$0xff] }
  0xb9   : > { %345 = vst.msk [vmem:[#allocation2 + $0xb8] sm:$0xff] %vm170_vm0, %v343_v24  ;;  %v587_v27 = vpack.c.bf16 %v404_v26, %v403_v25 }
  0xbb   : > { %v353_v28 = vpop.permute.xlu1 %352  ;;  %v351_v29 = vpop.permute.xlu0 %350  ;;  %588 = vmatpush1.bf16.msra.mxu0 %v587_v27 }
  0xbc   : > { %v355_v30 = vsel %vm354_vm6, %v351_v29, %v353_v28  ;;  %589 = vmatprep.subr.bf16.mxu0 %v622_v0  ;;  %v405_v34 = vld [vmem:[#allocation2 + $0xb0] sm:$0xff] }
  0xbd   : > { %357 = vst.msk [vmem:[#allocation2 + $0xc0] sm:$0xff] %vm170_vm0, %v355_v30 }
  0xbf   : > { %v365_v31 = vpop.permute.xlu1 %364  ;;  %v363_v32 = vpop.permute.xlu0 %362 }
  0xc0   : > { %v366_v33 = vsel %vm354_vm6, %v363_v32, %v365_v31  ;;  %v406_v35 = vld [vmem:[#allocation2 + $0xb8] sm:$0xff] }
  0xc1   : > { %368 = vst.msk [vmem:[#allocation2 + $0xc8] sm:$0xff] %vm170_vm0, %v366_v33  ;;  %v590_v36 = vpack.c.bf16 %v406_v35, %v405_v34 }
  0xc3   : > { %591 = vmatpush1.bf16.msra.mxu0 %v590_v36  ;;  %v376_v37 = vpop.permute.xlu1 %375  ;;  %v374_v38 = vpop.permute.xlu0 %373 }
  0xc4   : > { %v378_v39 = vsel %vm377_vm7, %v374_v38, %v376_v37  ;;  %592 = vmatprep.subr.bf16.mxu0 %v622_v0  ;;  %v407_v40 = vld [vmem:[#allocation2 + $0xc0] sm:$0xff] }
  0xc5   : > { %380 = vst.msk [vmem:[#allocation2 + $0xd0] sm:$0xff] %vm170_vm0, %v378_v39 }
  0xc8   : > { %v408_v41 = vld [vmem:[#allocation2 + $0xc8] sm:$0xff] }
  0xc9   : > { %v593_v42 = vpack.c.bf16 %v408_v41, %v407_v40 }
  0xcb   : > { %594 = vmatpush1.bf16.msra.mxu0 %v593_v42 }
  0xcc   : > { %472 = vmatprep.subr.mxu0 %v631_v43  ;;  %v409_v44 = vld [vmem:[#allocation2 + $0xd0] sm:$0xff] }
  0xcf   : > { %473 = vmatpush1.msra.mxu0 %v409_v44 }
  0xd0   : > { %485 = vmatmul.mubr.f32.vlgmr.msra.gmra.mrb[0].mxu0 %v381_v45 }
  0xd4   : > { %v414_v46 = vpop.permute.xlu0 %413 }
 0x1a3   : > { %v486_v0 = vpop.f32.mrb[0].mxu0 }
 0x1a4   : > { %v487_v47 = vadd.f32 %v486_v0, %v414_v46  ;;  %v488_v48 = vpop.f32.mrb[1].mxu0 }
 0x1a6   : > { %490 = vst.msk [vmem:[%s168_s7] sm:$0xff] %vm170_vm0, %v487_v47 }
 0x1a7 PF: > { %s13_s12 = sadd.s32 1, %s620_s12  }
 0x1a8   : > { %p10_p4 = scmp.ge.s32.totalorder %s13_s12, 4  }
 0x1aa   :  { %12 = sbr.rel (!%p10_p4) target bundleno = 1 (0x1), region = 62 }

</bundles_post_ra>
